<compile_context>
chip_gen: v6e
topology: v6e:2x2x1
jax: 0.10.0
libtpu: 0.0.40
codegen_flags: <defaults>
</compile_context>

<pallas_src>
import math

import jax
import jax.numpy as jnp
from jax import lax
from jax.experimental import pallas as pl
from jax.experimental.pallas import tpu as pltpu


def _round_up(n, m):
    return ((n + m - 1) // m) * m


def _pos_enc_kernel(x_ref, s_ref, off_ref, o_ref):
    # x_ref:   (tm, D)        input rows
    # s_ref:   (D, 2*D*N)     scaled selection matrix (f32)
    # off_ref: (1, 2*D*N)     phase offset: 0 (sin half) / pi/2 (cos half)
    # o_ref:   (tm, 2*D*N)    output block (lane-dense)
    x = x_ref[...].astype(jnp.float32)
    phase = jnp.dot(
        x, s_ref[...],
        preferred_element_type=jnp.float32,
        precision=lax.Precision.HIGHEST,   # keep f32 phase accuracy on the MXU
    )
    phase = phase + off_ref[...]           # sublane-broadcast add
    o_ref[...] = jnp.sin(phase).astype(o_ref.dtype)


def positional_encode(x, bands, *, tm=2048, out_dtype=None):
    """x: (..., D) array, bands: (N,) array -> (..., 2*D*N)."""
    D = x.shape[-1]
    N = bands.shape[0]
    F = 2 * D * N
    lead = x.shape[:-1]
    M = math.prod(lead) if lead else 1
    out_dtype = x.dtype if out_dtype is None else jnp.dtype(out_dtype)

    x2 = x.reshape(M, D)

    # Build the scaled-selection matrix and phase offsets (f32, tiny: D*F + F).
    bands_f32 = bands.astype(jnp.float32)
    j = jnp.arange(F)
    d_of_j = (j % (D * N)) // N
    n_of_j = j % N
    S = jnp.where(jnp.arange(D)[:, None] == d_of_j[None, :],
                  bands_f32[n_of_j][None, :], 0.0).astype(jnp.float32)
    offset = jnp.where(j >= D * N, math.pi / 2.0, 0.0).astype(
        jnp.float32).reshape(1, F)

    # Row tile: as large as requested, multiple of 8, but keep >= ~4 grid
    # blocks for moderate M so both v7x TensorCores / megacore have work.
    tm_eff = min(tm, _round_up(M, 8))
    if M > 32:
        tm_eff = min(tm_eff, _round_up(pl.cdiv(M, 4), 8))
    tm_eff = max(tm_eff, 8)
    grid = pl.cdiv(M, tm_eff)              # ragged edge -> masked writes

    out_bytes = jnp.dtype(out_dtype).itemsize
    in_bytes = jnp.dtype(x2.dtype).itemsize

    # Double-buffered footprint (input block lane-pads D -> 128 in VMEM).
    blk_out = tm_eff * F * out_bytes
    blk_in = tm_eff * 128 * in_bytes
    vmem_bytes = 2 * (blk_out + blk_in) + (2 << 20)
    vmem_limit = int(min(max(vmem_bytes, 32 << 20), 48 << 20))

    cost = pl.CostEstimate(
        flops=2 * M * D * F,
        transcendentals=M * F,
        bytes_accessed=M * D * in_bytes + M * F * out_bytes + (D + 1) * F * 4,
    )

    out = pl.pallas_call(
        _pos_enc_kernel,
        out_shape=jax.ShapeDtypeStruct((M, F), out_dtype),
        grid_spec=pltpu.PrefetchScalarGridSpec(
            num_scalar_prefetch=0,
            grid=(grid,),
            in_specs=[
                pl.BlockSpec((tm_eff, D), lambda i: (i, 0)),
                pl.BlockSpec((D, F), lambda i: (0, 0)),
                pl.BlockSpec((1, F), lambda i: (0, 0)),
            ],
            out_specs=pl.BlockSpec((tm_eff, F), lambda i: (i, 0)),
        ),
        compiler_params=pltpu.CompilerParams(
            dimension_semantics=("parallel",),
            vmem_limit_bytes=vmem_limit,
        ),
        cost_estimate=cost,
    )(x2, S, offset)

    return out.reshape(lead + (F,))


def make_bands(max_freq=6.0, N=64, log_sampling=False):
    # Mirrors the module's __init__ (non-trainable parameter).
    if log_sampling:
        return 2.0 ** jnp.linspace(1.0, max_freq, N, dtype=jnp.float32)
    return jnp.linspace(1.0, 2.0 ** max_freq, N, dtype=jnp.float32)


def reference(x, bands):
    # Pure-JAX reference matching the PyTorch forward exactly.
    raw = x[..., :, None] * bands[None, :]          # x.shape + (N,)
    raw = raw.reshape(x.shape[:-1] + (-1,))         # (..., D*N)
    return jnp.concatenate([jnp.sin(raw), jnp.cos(raw)], axis=-1)


if __name__ == "__main__":
    key = jax.random.PRNGKey(0)
    input_dims, max_freq, N = 3, 6.0, 64
    batch, points = 2, 16

    bands = make_bands(max_freq=max_freq, N=N, log_sampling=False)

    # Main run.
    x = jax.random.normal(key, (batch, points, input_dims), dtype=jnp.float32)
    out = jax.block_until_ready(positional_encode(x, bands))
    ref = reference(x, bands)
    assert out.shape == (batch, points, 2 * input_dims * N), out.shape

    # Tolerance: the MXU phase (HIGHEST precision) and cos-as-sin(x + pi/2)
    # differ from the exact-f32 reference by a few ULPs of the (large) phase,
    # which sin maps 1:1 into the output. Budget 16 phase-ULPs.
    max_phase = float(jnp.max(jnp.abs(x))) * (2.0 ** max_freq)
    tol = max(2e-5, 16.0 * max_phase * 2.0 ** -24)
    err = float(jnp.max(jnp.abs(out - ref)))
    assert err <= tol, (err, tol)

    # Ragged-M path (edge block handled by masked writes; no pad/slice copies).
    x_odd = jax.random.normal(key, (batch, 5, input_dims), dtype=jnp.float32)
    out_odd = jax.block_until_ready(positional_encode(x_odd, bands))
    assert out_odd.shape == (batch, 5, 2 * input_dims * N), out_odd.shape
    assert float(jnp.max(jnp.abs(out_odd - reference(x_odd, bands)))) <= tol

    # bf16 output (recommended on write-bound v5e/v6e); explicit accuracy trade.
    out_bf16 = jax.block_until_ready(
        positional_encode(x, bands, out_dtype=jnp.bfloat16))
    assert jnp.allclose(out_bf16.astype(jnp.float32), ref, atol=2e-2, rtol=2e-2)

    print("KERNEL_OK")
</pallas_src>

<mosaic_0001>
module attributes {stable_mosaic.version = 11 : i64} {
  func.func @_pos_enc_kernel(%arg0: i32, %arg1: memref<32x3xf32, #tpu.memory_space<vmem>>, %arg2: memref<3x384xf32, #tpu.memory_space<vmem>>, %arg3: memref<1x384xf32, #tpu.memory_space<vmem>>, %arg4: memref<32x384xf32, #tpu.memory_space<vmem>>) attributes {dimension_semantics = [#tpu.dimension_semantics<parallel>], iteration_bounds = array<i64: 1>, scalar_prefetch = 0 : i64, scratch_operands = 0 : i64, tpu.core_type = #tpu.core_type<tc>, window_params = [{transform_indices = @transform_0, window_bounds = array<i64: 32, 3>}, {pipeline_mode = #tpu.pipeline_mode<synchronous>, transform_indices = @transform_1, window_bounds = array<i64: 3, 384>}, {pipeline_mode = #tpu.pipeline_mode<synchronous>, transform_indices = @transform_2, window_bounds = array<i64: 1, 384>}, {transform_indices = @transform_3, window_bounds = array<i64: 32, 384>}]} {
    %c0 = arith.constant 0 : index
    %c0_0 = arith.constant 0 : index
    %0 = vector.load %arg1[%c0, %c0_0] : memref<32x3xf32, #tpu.memory_space<vmem>>, vector<32x3xf32>
    %c0_1 = arith.constant 0 : index
    %c0_2 = arith.constant 0 : index
    %1 = vector.load %arg2[%c0_1, %c0_2] : memref<3x384xf32, #tpu.memory_space<vmem>>, vector<3x384xf32>
    %cst = arith.constant dense<0.000000e+00> : vector<32x384xf32>
    %2 = tpu.matmul %0, %1, %cst {dimension_numbers = #tpu.dot_dimension_numbers<[1], [0], [0], [1], [0, 0, 1, 1], [], []>, precision = #tpu.contract_precision<fp32>} : vector<32x3xf32>, vector<3x384xf32>, vector<32x384xf32> -> vector<32x384xf32>
    %c0_3 = arith.constant 0 : index
    %c0_4 = arith.constant 0 : index
    %3 = vector.load %arg3[%c0_3, %c0_4] : memref<1x384xf32, #tpu.memory_space<vmem>>, vector<1x384xf32>
    %4 = vector.broadcast %3 : vector<1x384xf32> to vector<32x384xf32>
    %5 = arith.addf %2, %4 : vector<32x384xf32>
    %6 = math.sin %5 : vector<32x384xf32>
    %c0_5 = arith.constant 0 : index
    %c0_6 = arith.constant 0 : index
    %7 = vector.load %arg4[%c0_5, %c0_6] : memref<32x384xf32, #tpu.memory_space<vmem>>, vector<32x384xf32>
    tpu.vector_store %arg4[%c0_5, %c0_6], %6 {strides = array<i32>} : memref<32x384xf32, #tpu.memory_space<vmem>>, vector<32x384xf32>,
    return
  }
  func.func @transform_0(%arg0: i32) -> (i32, i32) {
    %c0_i32 = arith.constant 0 : i32
    %c0_i32_0 = arith.constant 0 : i32
    return %arg0, %c0_i32 : i32, i32
  }
  func.func @transform_1(%arg0: i32) -> (i32, i32) {
    %c0_i32 = arith.constant 0 : i32
    %c0_i32_0 = arith.constant 0 : i32
    %c0_i32_1 = arith.constant 0 : i32
    return %c0_i32, %c0_i32_0 : i32, i32
  }
  func.func @transform_2(%arg0: i32) -> (i32, i32) {
    %c0_i32 = arith.constant 0 : i32
    %c0_i32_0 = arith.constant 0 : i32
    %c0_i32_1 = arith.constant 0 : i32
    return %c0_i32, %c0_i32_0 : i32, i32
  }
  func.func @transform_3(%arg0: i32) -> (i32, i32) {
    %c0_i32 = arith.constant 0 : i32
    %c0_i32_0 = arith.constant 0 : i32
    return %arg0, %c0_i32 : i32, i32
  }
}

</mosaic_0001>

<bundles_post_ra>
// kernel: tpu_custom_call.1
= control target key start
LH: loop header
LB: loop body
LE: loop exit
PB: predicated region body
PF: predicated region fallthrough
CT: control target
= control target key end

     0   :  { %vm54_vm0 = vcmask 1042432   ;;  %v2780_v3 = vmov 0.0   ;;  %vm41_vm1 = vcmask 23552   ;;  %s3968_s0 = inlined_call_operand.vmem [shape: f32[32,3], index: 0, kind: input, shape index: {}]   ;;  %s3969_s1 = inlined_call_operand.vmem [shape: f32[3,384], index: 1, kind: input, shape index: {}]   ;;  %s3970_s2 = inlined_call_operand.vmem [shape: f32[1,384], index: 2, kind: input, shape index: {}]   ;;  %s3971_s3 = inlined_call_operand.hbm [shape: f32[32,384], index: 3, kind: output, shape index: {}]  }
   0x1   :  { %v19_v0 = vld [vmem:[%s3969_s1] sm:$0x77]  ;;  %127 = vmatprep.mubr.f32.mxu0 %v2780_v3  ;;  %246 = vmatprep.mubr.f32.mxu1 %v2780_v3  ;;  %v16_v5 = vld [vmem:[%s3968_s0 + $0x8] sm:$0xff]  ;;  %v17_v6 = vld [vmem:[%s3968_s0 + $0x10] sm:$0xff] }
   0x2   :  { %v40_v1 = vcombine.high %v19_v0, %v19_v0  ;;  %v55_v2 = vsel %vm54_vm0, %v19_v0, 0  ;;  %v15_v4 = vld [vmem:[%s3968_s0] sm:$0xff]  ;;  %v46_v9 = vsel %vm41_vm1, %v16_v5, 0  ;;  %v18_v10 = vld [vmem:[%s3968_s0 + $0x18] sm:$0xff]  ;;  %v49_v14 = vsel %vm41_vm1, %v17_v6, 0 }
   0x3   :  { %v2825_v7 = vand.u32 4294901760, %v55_v2  ;;  %v43_v8 = vsel %vm41_vm1, %v15_v4, 0  ;;  %v2833_v13 = vand.u32 4294901760, %v46_v9  ;;  %v2836_v17 = vand.u32 4294901760, %v49_v14 }
   0x4   :  { %v57_v11 = vsel %vm54_vm0, %v40_v1, 0  ;;  %v2831_v12 = vand.u32 4294901760, %v43_v8  ;;  %v52_v18 = vsel %vm41_vm1, %v18_v10, 0 }
   0x5   :  { %v91_v15 = vand.u32 4294901760, %v57_v11  ;;  %v209_v16 = vsub.f32 %v55_v2, %v2825_v7 }
   0x6   :  { %8 = vsyncpa [#allocation3], 0  ;;  %v2839_v19 = vsub.f32 %v43_v8, %v2831_v12  ;;  %v2842_v20 = vsub.f32 %v46_v9, %v2833_v13  ;;  %v2844_v21 = vand.u32 4294901760, %v52_v18  ;;  %v2847_v24 = vsub.f32 %v49_v14, %v2836_v17  ;;  %v20_v29 = vld [vmem:[%s3969_s1 + $0x8] sm:$0x7] }
   0x7   :  { %92 = vmatprep.subr.mxu0 %v91_v15  ;;  %v203_v22 = vsub.f32 %v57_v11, %v91_v15  ;;  %v210_v23 = vand.u32 4294901760, %v209_v16  ;;  %v59_v37 = vsel %vm54_vm0, %v20_v29, 0  ;;  %v23_v50 = vlaneseq  ;;  %v21_v55 = vld [vmem:[%s3970_s2] sm:$0x7] }
   0x8   :  { %94 = vmatpush1.msra.mxu0 %v2825_v7  ;;  %v2851_v25 = vand.u32 4294901760, %v2839_v19  ;;  %v2854_v26 = vand.u32 4294901760, %v2842_v20  ;;  %v2864_v32 = vand.u32 4294901760, %v2847_v24  ;;  %v2867_v33 = vsub.f32 %v52_v18, %v2844_v21 }
   0x9   :  { %v204_v27 = vand.u32 4294901760, %v203_v22  ;;  %307 = vmatprep.subr.mxu0 %v203_v22  ;;  %v211_v28 = vsub.f32 %v209_v16, %v210_v23  ;;  %v2881_v42 = vand.u32 4294901760, %v59_v37  ;;  %v2958_v51 = vshrl.u32 %v23_v50, 7 }
   0xa   :  { %v131_v30 = vsub.f32 %v2839_v19, %v2851_v25  ;;  %v142_v31 = vsub.f32 %v2842_v20, %v2854_v26  ;;  %v153_v40 = vsub.f32 %v2847_v24, %v2864_v32  ;;  %v2878_v41 = vand.u32 4294901760, %v2867_v33 }
   0xb   :  { %v205_v34 = vsub.f32 %v203_v22, %v204_v27  ;;  %v212_v36 = vand.u32 4294901760, %v211_v28  ;;  %v811_v45 = vsub.f32 %v59_v37, %v2881_v42  ;;  %v29_v53 = vsub.s32 1, %v2958_v51 }
   0xc   :  { %v2869_v35 = vand.u32 4294901760, %v131_v30  ;;  %v2873_v39 = vand.u32 4294901760, %v142_v31  ;;  %v154_v43 = vand.u32 4294901760, %v153_v40  ;;  %v164_v44 = vsub.f32 %v2867_v33, %v2878_v41 }
   0xd   :  { %v206_v38 = vand.u32 4294901760, %v205_v34  ;;  %v812_v47 = vand.u32 4294901760, %v811_v45  ;;  %v25_v56 = vsub.s32 0, %v2958_v51  ;;  %v30_v60 = vrot.slane %v21_v55, %v29_v53 }
   0xe   :  { %133 = vmatmul.mubr.f32.vlgmr.msra.gmra.mxu0 %v2869_v35  ;;  %v165_v46 = vand.u32 4294901760, %v164_v44 }
   0xf   :  { %207 = vmatprep.subr.mxu1 %v206_v38  ;;  %138 = vmatprep.mubr.f32.mxu0 %v2780_v3  ;;  %v813_v48 = vsub.f32 %v811_v45, %v812_v47  ;;  %v26_v62 = vrot.slane %v21_v55, %v25_v56 }
  0x10   :  { %213 = vmatpush1.msra.mxu1 %v212_v36  ;;  %310 = vmatpush1.msra.mxu0 %v209_v16 }
  0x11   :  { %248 = vmatmul.mubr.f32.vlgmr.msra.gmra.mxu1 %v2831_v12  ;;  %407 = vmatprep.subr.mxu1 %v91_v15  ;;  %v814_v49 = vand.u32 4294901760, %v813_v48 }
  0x12   :  { %144 = vmatmul.mubr.f32.gmra.mxu0 %v2873_v39  ;;  %409 = vmatpush1.msra.mxu1 %v2825_v7 }
  0x13   :  { %149 = vmatprep.mubr.f32.mxu0 %v2780_v3  ;;  %253 = vmatprep.mubr.f32.mxu1 %v2780_v3 }
  0x14   :  { %512 = vmatprep.subr.mxu0 %v204_v27  ;;  %609 = vmatprep.subr.mxu1 %v91_v15 }
  0x15   :  { %255 = vmatmul.mubr.f32.gmra.mxu1 %v2833_v13 }
  0x16   :  { %155 = vmatmul.mubr.f32.gmra.mxu0 %v154_v43  ;;  %260 = vmatprep.mubr.f32.mxu1 %v2780_v3 }
  0x17   :  { %160 = vmatprep.mubr.f32.mxu0 %v2780_v3 }
  0x19   :  { %262 = vmatmul.mubr.f32.gmra.mxu1 %v2836_v17 }
  0x1a   :  { %166 = vmatmul.mubr.f32.gmra.mxu0 %v165_v46  ;;  %267 = vmatprep.mubr.f32.mxu1 %v2780_v3 }
  0x1b   :  { %343 = vmatprep.mubr.f32.mxu0 %v2780_v3 }
  0x1d   :  { %269 = vmatmul.mubr.f32.gmra.mxu1 %v2844_v21 }
  0x1e   :  { %346 = vmatmul.mubr.f32.vlgmr.msra.gmra.mxu0 %v2839_v19  ;;  %442 = vmatprep.mubr.f32.mxu1 %v2780_v3 }
  0x1f   :  { %351 = vmatprep.mubr.f32.mxu0 %v2780_v3  ;;  %516 = vmatpush1.msra.mxu0 %v210_v23 }
  0x20   :  { %2602 = vmatprep.subr.mxu0 %v2881_v42 }
  0x21   :  { %446 = vmatmul.mubr.f32.vlgmr.msra.gmra.mxu1 %v2851_v25 }
  0x22   :  { %354 = vmatmul.mubr.f32.gmra.mxu0 %v2842_v20  ;;  %611 = vmatpush1.msra.mxu1 %v2825_v7 }
  0x23   :  { %359 = vmatprep.mubr.f32.mxu0 %v2780_v3  ;;  %451 = vmatprep.mubr.f32.mxu1 %v2780_v3 }
  0x24   :  { %2610 = vmatprep.subr.mxu1 %v814_v49 }
  0x25   :  { %455 = vmatmul.mubr.f32.gmra.mxu1 %v2854_v26 }
  0x26   :  { %362 = vmatmul.mubr.f32.gmra.mxu0 %v2847_v24  ;;  %460 = vmatprep.mubr.f32.mxu1 %v2780_v3 }
  0x27   :  { %367 = vmatprep.mubr.f32.mxu0 %v2780_v3 }
  0x29   :  { %464 = vmatmul.mubr.f32.gmra.mxu1 %v2864_v32 }
  0x2a   :  { %370 = vmatmul.mubr.f32.gmra.mxu0 %v2867_v33  ;;  %469 = vmatprep.mubr.f32.mxu1 %v2780_v3 }
  0x2b   :  { %549 = vmatprep.mubr.f32.mxu0 %v2780_v3 }
  0x2d   :  { %473 = vmatmul.mubr.f32.gmra.mxu1 %v2878_v41 }
  0x2e   :  { %551 = vmatmul.mubr.f32.vlgmr.msra.gmra.mxu0 %v2831_v12  ;;  %644 = vmatprep.mubr.f32.mxu1 %v2780_v3 }
  0x2f   :  { %556 = vmatprep.mubr.f32.mxu0 %v2780_v3  ;;  %2603 = vmatpush3.msra.mxu0 %v2881_v42 }
  0x30   :  { %2618 = vmatprep.subr.mxu0 %v811_v45 }
  0x31   :  { %646 = vmatmul.mubr.f32.vlgmr.msra.gmra.mxu1 %v2831_v12 }
  0x32   :  { %558 = vmatmul.mubr.f32.gmra.mxu0 %v2833_v13  ;;  %2611 = vmatpush3.msra.mxu1 %v814_v49 }
  0x33   :  { %563 = vmatprep.mubr.f32.mxu0 %v2780_v3  ;;  %651 = vmatprep.mubr.f32.mxu1 %v2780_v3 }
  0x34   :  { %2626 = vmatprep.subr.mxu1 %v2881_v42 }
  0x35   :  { %653 = vmatmul.mubr.f32.gmra.mxu1 %v2833_v13 }
  0x36   :  { %565 = vmatmul.mubr.f32.gmra.mxu0 %v2836_v17  ;;  %658 = vmatprep.mubr.f32.mxu1 %v2780_v3 }
  0x37   :  { %570 = vmatprep.mubr.f32.mxu0 %v2780_v3 }
  0x39   :  { %660 = vmatmul.mubr.f32.gmra.mxu1 %v2836_v17 }
  0x3a   :  { %572 = vmatmul.mubr.f32.gmra.mxu0 %v2844_v21  ;;  %665 = vmatprep.mubr.f32.mxu1 %v2780_v3 }
  0x3b   :  { %2604 = vmatprep.mubr.f32.mxu0 %v2869_v35 }
  0x3d   :  { %667 = vmatmul.mubr.f32.gmra.mxu1 %v2844_v21 }
  0x3e   :  { %2605 = vmatmul.mubr.f32.vlgmr.msra.gmra.mxu0 %v2873_v39  ;;  %2612 = vmatprep.mubr.f32.mxu1 %v2831_v12 }
  0x3f   :  { %2607 = vmatprep.mubr.f32.mxu0 %v154_v43  ;;  %2619 = vmatpush3.msra.mxu0 %v811_v45 }
  0x40   :  { %2634 = vmatprep.subr.mxu0 %v812_v47 }
  0x41   :  { %2613 = vmatmul.mubr.f32.vlgmr.msra.gmra.mxu1 %v2833_v13 }
  0x42   :  { %2608 = vmatmul.mubr.f32.gmra.mxu0 %v165_v46  ;;  %2627 = vmatpush3.msra.mxu1 %v2881_v42 }
  0x43   :  { %2615 = vmatprep.mubr.f32.mxu1 %v2836_v17  ;;  %2620 = vmatprep.mubr.f32.mxu0 %v2839_v19 }
  0x44   :  { %2642 = vmatprep.subr.mxu1 %v2881_v42 }
  0x45   :  { %2616 = vmatmul.mubr.f32.gmra.mxu1 %v2844_v21 }
  0x46   :  { %2621 = vmatmul.mubr.f32.vlgmr.msra.gmra.mxu0 %v2842_v20  ;;  %2628 = vmatprep.mubr.f32.mxu1 %v2851_v25 }
  0x47   :  { %2623 = vmatprep.mubr.f32.mxu0 %v2847_v24  ;;  %2635 = vmatpush3.msra.mxu0 %v812_v47 }
  0x49   :  { %2629 = vmatmul.mubr.f32.vlgmr.msra.gmra.mxu1 %v2854_v26 }
  0x4a   :  { %2624 = vmatmul.mubr.f32.gmra.mxu0 %v2867_v33  ;;  %2643 = vmatpush3.msra.mxu1 %v2881_v42 }
  0x4b   :  { %2631 = vmatprep.mubr.f32.mxu1 %v2864_v32  ;;  %2636 = vmatprep.mubr.f32.mxu0 %v2831_v12 }
  0x4d   :  { %2632 = vmatmul.mubr.f32.gmra.mxu1 %v2878_v41 }
  0x4e   :  { %2637 = vmatmul.mubr.f32.vlgmr.msra.gmra.mxu0 %v2833_v13  ;;  %2644 = vmatprep.mubr.f32.mxu1 %v2831_v12 }
  0x4f   :  { %2639 = vmatprep.mubr.f32.mxu0 %v2836_v17 }
  0x51   :  { %2645 = vmatmul.mubr.f32.vlgmr.msra.gmra.mxu1 %v2833_v13 }
  0x52   :  { %2640 = vmatmul.mubr.f32.gmra.mxu0 %v2844_v21  ;;  %2647 = vmatprep.mubr.f32.mxu1 %v2836_v17 }
  0x55   :  { %2648 = vmatmul.mubr.f32.gmra.mxu1 %v2844_v21 }
  0xce   :  { %v134_v52 = vpop.f32.mrf.mxu0 }
  0xcf   :  { %v135_v27 = vadd.f32 %v134_v52, %v26_v62 }
  0xd0   :  { %v136_v54 = vpop.f32.mrf.mxu0 }
  0xd1   :  { %v249_v57 = vpop.f32.mrf.mxu1  ;;  %v137_v38 = vadd.f32 %v136_v54, %v30_v60 }
  0xd2   :  { %v145_v58 = vpop.f32.mrf.mxu0  ;;  %v250_v35 = vadd.f32 %v249_v57, %v135_v27 }
  0xd3   :  { %v251_v59 = vpop.f32.mrf.mxu1  ;;  %v146_v39 = vadd.f32 %v145_v58, %v26_v62 }
  0xd4   :  { %v147_v61 = vpop.f32.mrf.mxu0  ;;  %v252_v45 = vadd.f32 %v251_v59, %v137_v38 }
  0xd5   :  { %v256_v63 = vpop.f32.mrf.mxu1  ;;  %v148_v0 = vadd.f32 %v147_v61, %v30_v60 }
  0xd6   :  { %v156_v1 = vpop.f32.mrf.mxu0  ;;  %v257_v52 = vadd.f32 %v256_v63, %v146_v39 }
  0xd7   :  { %v157_v2 = vadd.f32 %v156_v1, %v26_v62  ;;  %v258_v3 = vpop.f32.mrf.mxu1 }
  0xd8   :  { %v158_v4 = vpop.f32.mrf.mxu0  ;;  %v259_v5 = vadd.f32 %v258_v3, %v148_v0 }
  0xd9   :  { %v159_v6 = vadd.f32 %v158_v4, %v30_v60  ;;  %v263_v7 = vpop.f32.mrf.mxu1 }
  0xda   :  { %v167_v8 = vpop.f32.mrf.mxu0  ;;  %v264_v9 = vadd.f32 %v263_v7, %v157_v2 }
  0xdb   :  { %v168_v10 = vadd.f32 %v167_v8, %v26_v62  ;;  %v265_v11 = vpop.f32.mrf.mxu1 }
  0xdc   :  { %v169_v12 = vpop.f32.mrf.mxu0  ;;  %v266_v13 = vadd.f32 %v265_v11, %v159_v6 }
  0xdd   :  { %v170_v14 = vadd.f32 %v169_v12, %v30_v60  ;;  %v270_v15 = vpop.f32.mrf.mxu1 }
  0xde   :  { %v271_v16 = vadd.f32 %v270_v15, %v168_v10  ;;  %v347_v17 = vpop.f32.mrf.mxu0 }
  0xdf   :  { %v272_v18 = vpop.f32.mrf.mxu1  ;;  %v348_v42 = vadd.f32 %v347_v17, %v250_v35 }
  0xe0   :  { %v273_v19 = vadd.f32 %v272_v18, %v170_v14  ;;  %v349_v20 = vpop.f32.mrf.mxu0 }
  0xe1   :  { %v447_v21 = vpop.f32.mrf.mxu1  ;;  %v350_v53 = vadd.f32 %v349_v20, %v252_v45 }
  0xe2   :  { %v355_v22 = vpop.f32.mrf.mxu0  ;;  %v448_v48 = vadd.f32 %v447_v21, %v348_v42 }
  0xe3   :  { %v449_v23 = vpop.f32.mrf.mxu1  ;;  %v356_v58 = vadd.f32 %v355_v22, %v257_v52 }
  0xe4   :  { %v357_v24 = vpop.f32.mrf.mxu0  ;;  %v450_v60 = vadd.f32 %v449_v23, %v350_v53 }
  0xe5   :  { %v358_v25 = vadd.f32 %v357_v24, %v259_v5  ;;  %v456_v26 = vpop.f32.mrf.mxu1 }
  0xe6   :  { %v363_v28 = vpop.f32.mrf.mxu0  ;;  %v457_v59 = vadd.f32 %v456_v26, %v356_v58 }
  0xe7   :  { %v364_v29 = vadd.f32 %v363_v28, %v264_v9  ;;  %v458_v30 = vpop.f32.mrf.mxu1 }
  0xe8   :  { %v365_v31 = vpop.f32.mrf.mxu0  ;;  %v459_v32 = vadd.f32 %v458_v30, %v358_v25 }
  0xe9   :  { %v366_v33 = vadd.f32 %v365_v31, %v266_v13  ;;  %v465_v34 = vpop.f32.mrf.mxu1  ;;  %v2781_v31 = vmov 683565275  }
  0xea   :  { %v371_v36 = vpop.f32.mrf.mxu0  ;;  %v2965_v37 = vadd.f32 %v465_v34, %v364_v29  ;;  %v2782_v34 = vmov 2475754826  }
  0xeb   :  { %v372_v40 = vadd.f32 %v371_v36, %v271_v16  ;;  %v467_v41 = vpop.f32.mrf.mxu1  ;;  %v2783_v36 = vmov 2131351028  }
  0xec   :  { %v373_v43 = vpop.f32.mrf.mxu0  ;;  %v2967_v44 = vadd.f32 %v467_v41, %v366_v33 }
  0xed   :  { %v374_v46 = vadd.f32 %v373_v43, %v273_v19  ;;  %v474_v47 = vpop.f32.mrf.mxu1 }
  0xee   :  { %v2969_v49 = vadd.f32 %v474_v47, %v372_v40  ;;  %v552_v50 = vpop.f32.mrf.mxu0  ;;  %v2785_v40 = vmov 920167782  }
  0xef   :  { %v476_v55 = vpop.f32.mrf.mxu1  ;;  %v553_v56 = vadd.f32 %v552_v50, %v448_v48  ;;  %v2786_v48 = vmov 1326507024  }
  0xf0   :  { %v2971_v57 = vadd.f32 %v476_v55, %v374_v46  ;;  %v554_v54 = vpop.f32.mrf.mxu0 }
  0xf1   :  { %v647_v61 = vpop.f32.mrf.mxu1  ;;  %v555_v1 = vadd.f32 %v554_v54, %v450_v60 }
  0xf2   :  { %v559_v62 = vpop.f32.mrf.mxu0  ;;  %v2973_v0 = vadd.f32 %v647_v61, %v553_v56 }
  0xf3   :  { %v649_v2 = vpop.f32.mrf.mxu1  ;;  %v560_v63 = vadd.f32 %v559_v62, %v457_v59 }
  0xf4   :  { %v1248_v3 = vand.u32 2147483647, %v2973_v0  ;;  %v1251_v4 = vand.u32 2139095040, %v2973_v0  ;;  %v2977_v5 = vadd.f32 %v649_v2, %v555_v1  ;;  %v561_v17 = vpop.f32.mrf.mxu0  ;;  %vm1250_vm15 = vcmp.lt.s32.totalorder %v2973_v0, 0 }
  0xf5   :  { %v654_v6 = vpop.f32.mrf.mxu1  ;;  %v2988_v25 = vadd.f32 %v561_v17, %v459_v32  ;;  %v2784_v32 = vmov 2102212464  }
  0xf6   :  { %v1252_v7 = vshrl.u32 %v1251_v4, 23  ;;  %v1255_v8 = vand.u32 8388607, %v1248_v3  ;;  %v1352_v9 = vand.u32 2147483647, %v2977_v5  ;;  %v1355_v10 = vand.u32 2139095040, %v2977_v5 }
  0xf7   :  { %v2983_v11 = vadd.f32 %v654_v6, %v560_v63  ;;  %vm3086_vm0 = vcmp.le.f32.partialorder %v1248_v3, 0.7853982 }
  0xf8   :  { %v2524_v12 = vadd.s32 4294967169, %v1252_v7  ;;  %v1356_v13 = vshrl.u32 %v1355_v10, 23  ;;  %v1359_v14 = vand.u32 8388607, %v1352_v9  ;;  %v1256_v16 = vor.u32 8388608, %v1255_v8 }
  0xf9   :  { %v1563_v20 = vand.u32 2139095040, %v2983_v11  ;;  %v1560_v28 = vand.u32 2147483647, %v2983_v11 }
  0xfa   :  { %v1258_v15 = vadd.s32 1, %v2524_v12  ;;  %v2528_v18 = vadd.s32 4294967169, %v1356_v13  ;;  %v1360_v19 = vor.u32 8388608, %v1359_v14  ;;  %v2990_v26 = vshll.u32 %v1256_v16, 8 }
  0xfb   :  { %v1564_v29 = vshrl.u32 %v1563_v20, 23 }
  0xfc   :  { %vm1259_vm2 = vcmp.gt.s32.totalorder %v1258_v15, 0  ;;  %v1362_v22 = vadd.s32 1, %v2528_v18  ;;  %v2992_v27 = vshll.u32 %v1360_v19, 8 }
  0xfd   :  { %v1260_v21 = vsel %vm1259_vm2, %v1258_v15, 0  ;;  %v2536_v12 = vadd.s32 4294967169, %v1564_v29 }
  0xfe   :  { %v1261_v23 = vshrl.u32 %v1260_v21, 5  ;;  %v1262_v24 = vand.u32 31, %v1260_v21  ;;  %vm1363_vm3 = vcmp.gt.s32.totalorder %v1362_v22, 0 }
  0xff   :  { %v1364_v56 = vsel %vm1363_vm3, %v1362_v22, 0 }
 0x100   :  { %v1263_v30 = vsub.s32 32, %v1262_v24  ;;  %v1265_v33 = vshll.u32 %v2781_v31, %v1262_v24  ;;  %v1268_v35 = vshll.u32 %v2782_v34, %v1262_v24  ;;  %v1271_v38 = vshll.u32 %v2783_v36, %v1262_v24 }
 0x101   :  { %v1274_v39 = vshll.u32 %v2784_v32, %v1262_v24  ;;  %v1277_v41 = vshll.u32 %v2785_v40, %v1262_v24  ;;  %vm1280_vm4 = vcmp.lt.s32.totalorder %v1261_v23, 1  ;;  %vm1281_vm5 = vcmp.lt.s32.totalorder %v1261_v23, 2 }
 0x102   :  { %v1266_v42 = vshrl.u32 %v2782_v34, %v1263_v30  ;;  %v1269_v43 = vshrl.u32 %v2783_v36, %v1263_v30  ;;  %v1272_v45 = vshrl.u32 %v2784_v32, %v1263_v30  ;;  %v1264_v46 = vshrl.u32 %v2781_v31, %v1263_v30 }
 0x103   :  { %v1275_v47 = vshrl.u32 %v2785_v40, %v1263_v30  ;;  %v1278_v50 = vshrl.u32 %v2786_v48, %v1263_v30  ;;  %vm1282_vm6 = vcmp.lt.s32.totalorder %v1261_v23, 3  ;;  %vm1283_vm7 = vcmp.lt.s32.totalorder %v1261_v23, 4 }
 0x104   :  { %v1267_v52 = vor.u32 %v1266_v42, %v1265_v33  ;;  %v1270_v53 = vor.u32 %v1269_v43, %v1268_v35  ;;  %v1273_v55 = vor.u32 %v1272_v45, %v1271_v38  ;;  %v1366_v60 = vand.u32 31, %v1364_v56 }
 0x105   :  { %v1276_v54 = vor.u32 %v1275_v47, %v1274_v39  ;;  %v1279_v58 = vor.u32 %v1278_v50, %v1277_v41  ;;  %v1365_v15 = vshrl.u32 %v1364_v56, 5 }
 0x106   :  { %v1284_v61 = vsel %vm1280_vm4, %v1264_v46, %v1267_v52  ;;  %v1285_v62 = vsel %vm1283_vm7, %v1273_v55, 2102212464  ;;  %v1288_v59 = vsel %vm1280_vm4, %v1267_v52, %v1270_v53  ;;  %v1292_v1 = vsel %vm1280_vm4, %v1270_v53, %v1273_v55 }
 0x107   :  { %v1286_v2 = vsel %vm1282_vm6, %v1270_v53, %v1285_v62  ;;  %v1289_v4 = vsel %vm1283_vm7, %v1276_v54, 920167782  ;;  %v1293_v63 = vsel %vm1283_vm7, %v1279_v58, 1326507024  ;;  %v1367_v6 = vsub.s32 32, %v1366_v60  ;;  %v656_v58 = vpop.f32.mrf.mxu1 }
 0x108   :  { %v1287_v7 = vsel %vm1281_vm5, %v1284_v61, %v1286_v2  ;;  %v1290_v8 = vsel %vm1282_vm6, %v1273_v55, %v1289_v4  ;;  %v1294_v10 = vsel %vm1282_vm6, %v1276_v54, %v1293_v63  ;;  %v1369_v16 = vshll.u32 %v2781_v31, %v1366_v60 }
 0x109   :  { %v1291_v13 = vsel %vm1281_vm5, %v1288_v59, %v1290_v8  ;;  %v1295_v14 = vsel %vm1281_vm5, %v1292_v1, %v1294_v10  ;;  %v1303_v21 = vmul.u32 %v2990_v26, %v1287_v7  ;;  %v1370_v22 = vshrl.u32 %v2782_v34, %v1367_v6 }
 0x10a   :  { %v3018_v17 = vmul.u32.u64.low %v2990_v26, %v1295_v14  ;;  %v3019_v18 = vmul.u32.u64.high %v2990_v26, %v1295_v14, %v3018_v17  ;;  %v3022_v19 = vmul.u32.u64.low %v2990_v26, %v1291_v13  ;;  %v3023_v20 = vmul.u32.u64.high %v2990_v26, %v1291_v13, %v3022_v19 }
 0x10b   :  { %v1372_v24 = vshll.u32 %v2782_v34, %v1366_v60  ;;  %v1373_v23 = vshrl.u32 %v2783_v36, %v1367_v6  ;;  %v1375_v29 = vshll.u32 %v2783_v36, %v1366_v60  ;;  %v1376_v30 = vshrl.u32 %v2784_v32, %v1367_v6 }
 0x10c   :  { %v1378_v33 = vshll.u32 %v2784_v32, %v1366_v60  ;;  %v1379_v35 = vshrl.u32 %v2785_v40, %v1367_v6  ;;  %v1371_v38 = vor.u32 %v1370_v22, %v1369_v16  ;;  %v1381_v41 = vshll.u32 %v2785_v40, %v1366_v60 }
 0x10d   :  { %v1374_v39 = vor.u32 %v1373_v23, %v1372_v24  ;;  %v1382_v26 = vshrl.u32 %v2786_v48, %v1367_v6  ;;  %vm1305_vm8 = vc.u32 %v3019_v18, %v3022_v19  ;;  %v1306_v42 = vadd.s32 1, %v3023_v20 }
 0x10e   :  { %v1368_v43 = vshrl.u32 %v2781_v31, %v1367_v6  ;;  %v1377_v45 = vor.u32 %v1376_v30, %v1375_v29  ;;  %v1380_v46 = vor.u32 %v1379_v35, %v1378_v33  ;;  %vm1384_vm9 = vcmp.lt.s32.totalorder %v1365_v15, 1 }
 0x10f   :  { %v1383_v47 = vor.u32 %v1382_v26, %v1381_v41  ;;  %vm1385_vm10 = vcmp.lt.s32.totalorder %v1365_v15, 2  ;;  %v1307_v50 = vsel %vm1305_vm8, %v1306_v42, %v3023_v20  ;;  %vm1386_vm11 = vcmp.lt.s32.totalorder %v1365_v15, 3 }
 0x110   :  { %vm1387_vm12 = vcmp.lt.s32.totalorder %v1365_v15, 4  ;;  %v1392_v52 = vsel %vm1384_vm9, %v1371_v38, %v1374_v39  ;;  %v1308_v53 = vadd.s32 %v1307_v50, %v1303_v21  ;;  %v1396_v54 = vsel %vm1384_vm9, %v1374_v39, %v1377_v45 }
 0x111   :  { %v1389_v55 = vsel %vm1387_vm12, %v1377_v45, 2102212464  ;;  %v1393_v56 = vsel %vm1387_vm12, %v1380_v46, 920167782  ;;  %v1388_v60 = vsel %vm1384_vm9, %v1368_v43, %v1371_v38  ;;  %v1397_v62 = vsel %vm1387_vm12, %v1383_v47, 1326507024 }
 0x112   :  { %v1394_v61 = vsel %vm1386_vm11, %v1377_v45, %v1393_v56  ;;  %v1570_v59 = vadd.s32 1, %v2536_v12  ;;  %v1309_v1 = vadd.s32 536870912, %v1308_v53  ;;  %v1390_v2 = vsel %vm1386_vm11, %v1374_v39, %v1389_v55 }
 0x113   :  { %v1395_v4 = vsel %vm1385_vm10, %v1392_v52, %v1394_v61  ;;  %v1398_v63 = vsel %vm1386_vm11, %v1380_v46, %v1397_v62  ;;  %v3049_v10 = vadd.f32 %v656_v58, %v2988_v25  ;;  %v1391_v12 = vsel %vm1385_vm10, %v1388_v60, %v1390_v2  ;;  %v566_v25 = vpop.f32.mrf.mxu0 }
 0x114   :  { %v1399_v6 = vsel %vm1385_vm10, %v1396_v54, %v1398_v63  ;;  %v3044_v7 = vmul.u32.u64.low %v2992_v27, %v1395_v4  ;;  %v3045_v8 = vmul.u32.u64.high %v2992_v27, %v1395_v4, %v3044_v7  ;;  %v1310_v13 = vshrl.u32 %v1309_v1, 30 }
 0x115   :  { %v3052_v14 = vmul.u32.u64.low %v2992_v27, %v1399_v6  ;;  %v3053_v16 = vmul.u32.u64.high %v2992_v27, %v1399_v6, %v3052_v14  ;;  %vm1571_vm13 = vcmp.gt.s32.totalorder %v1570_v59, 0  ;;  %v1667_v24 = vand.u32 2139095040, %v3049_v10 }
 0x116   :  { %v1572_v17 = vsel %vm1571_vm13, %v1570_v59, 0  ;;  %v1311_v20 = vshll.u32 %v1310_v13, 30  ;;  %v1410_v22 = vadd.s32 1, %v3045_v8  ;;  %v1407_v29 = vmul.u32 %v2992_v27, %v1391_v12 }
 0x117   :  { %v1574_v21 = vand.u32 31, %v1572_v17  ;;  %vm1409_vm14 = vc.u32 %v3053_v16, %v3044_v7  ;;  %v3063_v30 = vand.u32 8388607, %v1560_v28  ;;  %v3068_v39 = vadd.f32 %v566_v25, %v2965_v37 }
 0x118   :  { %v1312_v23 = vsub.s32 %v1308_v53, %v1311_v20  ;;  %v1411_v15 = vsel %vm1409_vm14, %v1410_v22, %v3045_v8  ;;  %v1668_v41 = vshrl.u32 %v1667_v24, 23  ;;  %v1664_v43 = vand.u32 2147483647, %v3049_v10 }
 0x119   :  { %v1575_v33 = vsub.s32 32, %v1574_v21  ;;  %v1412_v38 = vadd.s32 %v1411_v15, %v1407_v29  ;;  %v1568_v42 = vor.u32 8388608, %v3063_v30  ;;  %v1304_v45 = vadd.s32 %v3022_v19, %v3019_v18 }
 0x11a   :  { %v1314_v35 = vsub.s32 0, %v1312_v23  ;;  %v1334_v46 = vsub.s32 4, %v1310_v13  ;;  %v3074_v47 = vshrl.u32 %v1572_v17, 5  ;;  %v1577_v54 = vshll.u32 %v2781_v31, %v1574_v21 }
 0x11b   :  { %v1413_v26 = vadd.s32 536870912, %v1412_v38  ;;  %v1584_v50 = vshrl.u32 %v2784_v32, %v1575_v33  ;;  %v1578_v53 = vshrl.u32 %v2782_v34, %v1575_v33  ;;  %v1581_v37 = vshrl.u32 %v2783_v36, %v1575_v33 }
 0x11c   :  { %v2525_v27 = vmin.u32 %v1314_v35, %v1312_v23  ;;  %v1587_v55 = vshrl.u32 %v2785_v40, %v1575_v33  ;;  %v1583_v58 = vshll.u32 %v2783_v36, %v1574_v21  ;;  %v2540_v60 = vadd.s32 4294967169, %v1668_v41 }
 0x11d   :  { %v3080_v56 = vshrl.u32 %v1413_v26, 30  ;;  %v1580_v61 = vshll.u32 %v2782_v34, %v1574_v21  ;;  %v1586_v62 = vshll.u32 %v2784_v32, %v1574_v21  ;;  %v1590_v59 = vshrl.u32 %v2786_v48, %v1575_v33 }
 0x11e   :  { %v1316_v52 = vclz %v2525_v27  ;;  %v1335_v1 = vsel %vm1250_vm15, %v1334_v46, %v1310_v13  ;;  %v1585_v4 = vor.u32 %v1584_v50, %v1583_v58  ;;  %v1589_v63 = vshll.u32 %v2785_v40, %v1574_v21 }
 0x11f   :  { %v1415_v2 = vshll.u32 %v3080_v56, 30  ;;  %v1579_v3 = vor.u32 %v1578_v53, %v1577_v54  ;;  %v1582_v6 = vor.u32 %v1581_v37, %v1580_v61  ;;  %v1588_v8 = vor.u32 %v1587_v55, %v1586_v62 }
 0x120   :  { %v2526_v19 = vadd.s32 4294967294, %v1316_v52  ;;  %v1576_v17 = vshrl.u32 %v2781_v31, %v1575_v33  ;;  %v1591_v20 = vor.u32 %v1590_v59, %v1589_v63  ;;  %vm1592_vm2 = vcmp.lt.s32.totalorder %v3074_v47, 1 }
 0x121   :  { %v3097_v12 = vsub.s32 %v1412_v38, %v1415_v2  ;;  %vm1595_vm3 = vcmp.lt.s32.totalorder %v3074_v47, 4  ;;  %vm1594_vm4 = vcmp.lt.s32.totalorder %v3074_v47, 3  ;;  %v1600_v15 = vsel %vm1592_vm2, %v1579_v3, %v1582_v6 }
 0x122   :  { %vm2527_vm1 = vcmp.lt.s32.totalorder %v2526_v19, 0  ;;  %v1597_v21 = vsel %vm1595_vm3, %v1585_v4, 2102212464  ;;  %v1601_v35 = vsel %vm1595_vm3, %v1588_v8, 920167782  ;;  %v1604_v41 = vsel %vm1592_vm2, %v1582_v6, %v1585_v4 }
 0x123   :  { %v1319_v14 = vsel %vm2527_vm1, 0, %v2526_v19  ;;  %v1418_v29 = vsub.s32 0, %v3097_v12  ;;  %v1602_v38 = vsel %vm1594_vm4, %v1585_v4, %v1601_v35  ;;  %vm1593_vm5 = vcmp.lt.s32.totalorder %v3074_v47, 2 }
 0x124   :  { %v1320_v22 = vsub.s32 32, %v1319_v14  ;;  %v1324_v24 = vsub.s32 4294967266, %v1319_v14  ;;  %v1321_v13 = vshll.u32 %v1312_v23, %v1319_v14  ;;  %v1605_v23 = vsel %vm1595_vm3, %v1591_v20, 1326507024 }
 0x125   :  { %v2529_v33 = vmin.u32 %v1418_v29, %v3097_v12  ;;  %v1337_v46 = vsel %vm3086_vm0, 0, %v1335_v1  ;;  %vm1354_vm6 = vcmp.lt.s32.totalorder %v2977_v5, 0  ;;  %v1603_v52 = vsel %vm1593_vm5, %v1600_v15, %v1602_v38 }
 0x126   :  { %v1322_v25 = vshrl.u32 %v1304_v45, %v1320_v22  ;;  %v1325_v30 = vadd.s32 127, %v1324_v24  ;;  %v1606_v45 = vsel %vm1594_vm4, %v1588_v8, %v1605_v23  ;;  %v1608_v53 = vshll.u32 %v1568_v42, 8 }
 0x127   :  { %v1420_v50 = vclz %v2529_v33  ;;  %v1596_v55 = vsel %vm1592_vm2, %v1576_v17, %v1579_v3  ;;  %v1598_v54 = vsel %vm1594_vm4, %v1582_v6, %v1597_v21  ;;  %v1607_v58 = vsel %vm1593_vm5, %v1604_v41, %v1606_v45 }
 0x128   :  { %v1323_v27 = vor.u32 %v1322_v25, %v1321_v13  ;;  %v1326_v26 = vshll.u32 %v1325_v30, 23  ;;  %v3125_v61 = vmul.u32.u64.low %v1608_v53, %v1607_v58  ;;  %v3126_v62 = vmul.u32.u64.high %v1608_v53, %v1607_v58, %v3125_v61  ;;  %v568_v13 = vpop.f32.mrf.mxu0 }
 0x129   :  { %v2530_v19 = vadd.s32 4294967294, %v1420_v50  ;;  %v1674_v59 = vadd.s32 1, %v2540_v60  ;;  %vm3130_vm7 = vcmp.le.f32.partialorder %v1352_v9, 0.7853982  ;;  %v1599_v3 = vsel %vm1593_vm5, %v1596_v55, %v1598_v54 }
 0x12a   :  { %v1327_v37 = vor.u32 4788187, %v1326_v26  ;;  %v1330_v2 = vcvt.s32.f32 %v1323_v27  ;;  %v3134_v4 = vmul.u32.u64.low %v1608_v53, %v1603_v52  ;;  %v3135_v63 = vmul.u32.u64.high %v1608_v53, %v1603_v52, %v3134_v4 }
 0x12b   :  { %vm2531_vm8 = vcmp.lt.s32.totalorder %v2530_v19, 0  ;;  %v3142_v6 = vand.u32 8388607, %v1664_v43  ;;  %vm1675_vm9 = vcmp.gt.s32.totalorder %v1674_v59, 0  ;;  %v1438_v9 = vsub.s32 4, %v3080_v56 }
 0x12c   :  { %v1328_v1 = vand.u32 2147483647, %v1327_v37  ;;  %v1423_v8 = vsel %vm2531_vm8, 0, %v2530_v19  ;;  %v1676_v14 = vsel %vm1675_vm9, %v1674_v59, 0  ;;  %v1341_v17 = vadd.s32 3, %v1337_v46 }
 0x12d   :  { %v1408_v20 = vadd.s32 %v3044_v7, %v3053_v16  ;;  %v1424_v22 = vsub.s32 32, %v1423_v8  ;;  %v1428_v24 = vsub.s32 4294967266, %v1423_v8  ;;  %v1615_v47 = vmul.u32 %v1608_v53, %v1599_v3 }
 0x12e   :  { %v1331_v60 = vmul.f32 %v1330_v2, %v1328_v1  ;;  %vm1617_vm10 = vc.u32 %v3126_v62, %v3134_v4  ;;  %v1618_v21 = vadd.s32 1, %v3135_v63  ;;  %v1425_v25 = vshll.u32 %v3097_v12, %v1423_v8 }
 0x12f   :  { %v1426_v30 = vshrl.u32 %v1408_v20, %v1424_v22  ;;  %v1429_v15 = vadd.s32 127, %v1428_v24  ;;  %v1678_v35 = vand.u32 31, %v1676_v14  ;;  %v1439_v7 = vsel %vm1354_vm6, %v1438_v9, %v3080_v56 }
 0x130   :  { %v1332_v29 = vxor.u32 2147483648, %v1331_v60  ;;  %v1619_v16 = vsel %vm1617_vm10, %v1618_v21, %v3135_v63  ;;  %v3158_v38 = vadd.f32 %v568_v13, %v2967_v44  ;;  %v3163_v26 = vand.u32 3, %v1341_v17 }
 0x131   :  { %v1427_v12 = vor.u32 %v1426_v30, %v1425_v25  ;;  %v1430_v23 = vshll.u32 %v1429_v15, 23  ;;  %v1620_v27 = vadd.s32 %v1619_v16, %v1615_v47  ;;  %v1672_v45 = vor.u32 8388608, %v3142_v6 }
 0x132   :  { %v1333_v33 = vsel %vm1250_vm15, %v1332_v29, %v1331_v60  ;;  %v1679_v46 = vsub.s32 32, %v1678_v35  ;;  %v1441_v50 = vsel %vm3130_vm7, 0, %v1439_v7  ;;  %v1681_v52 = vshll.u32 %v2781_v31, %v1678_v35 }
 0x133   :  { %v1336_v41 = vsel %vm3086_vm0, %v2973_v0, %v1333_v33  ;;  %v1431_v56 = vor.u32 4788187, %v1430_v23  ;;  %v1621_v44 = vadd.s32 536870912, %v1620_v27  ;;  %v1684_v53 = vshll.u32 %v2782_v34, %v1678_v35  ;;  %v661_v33 = vpop.f32.mrf.mxu1 }
 0x134   :  { %2709 = vcosq.f32 %v1336_v41  ;;  %v1682_v18 = vshrl.u32 %v2782_v34, %v1679_v46  ;;  %v1685_v37 = vshrl.u32 %v2783_v36, %v1679_v46  ;;  %v1434_v54 = vcvt.s32.f32 %v1427_v12 }
 0x135   :  { %2711 = vsinq.f32 %v1336_v41  ;;  %v1432_v55 = vand.u32 2147483647, %v1431_v56  ;;  %v3172_v58 = vshrl.u32 %v1621_v44, 30  ;;  %v1688_v19 = vshrl.u32 %v2784_v32, %v1679_v46 }
 0x136   :  { %v3175_v61 = vshrl.u32 %v1676_v14, 5  ;;  %v1687_v59 = vshll.u32 %v2783_v36, %v1678_v35  ;;  %v1690_v1 = vshll.u32 %v2784_v32, %v1678_v35  ;;  %v1691_v2 = vshrl.u32 %v2785_v40, %v1679_v46 }
 0x137   :  { %v1435_v63 = vmul.f32 %v1434_v54, %v1432_v55  ;;  %v1623_v3 = vshll.u32 %v3172_v58, 30  ;;  %v1683_v6 = vor.u32 %v1682_v18, %v1681_v52  ;;  %v1686_v60 = vor.u32 %v1685_v37, %v1684_v53 }
 0x138   :  { %v1689_v8 = vor.u32 %v1688_v19, %v1687_v59  ;;  %v1692_v9 = vor.u32 %v1691_v2, %v1690_v1  ;;  %v1693_v17 = vshll.u32 %v2785_v40, %v1678_v35  ;;  %v1694_v20 = vshrl.u32 %v2786_v48, %v1679_v46 }
 0x139   :  { %vm1347_vm11 = vcmp.eq.s32.totalorder %v3163_v26, 2  ;;  %v1436_v14 = vxor.u32 2147483648, %v1435_v63  ;;  %v1445_v22 = vadd.s32 3, %v1441_v50  ;;  %v3184_v24 = vsub.s32 %v1620_v27, %v1623_v3 }
 0x13a   :  { %vm1344_vm12 = vcmp.eq.s32.totalorder %v3163_v26, 0  ;;  %v1695_v13 = vor.u32 %v1694_v20, %v1693_v17  ;;  %vm1696_vm13 = vcmp.lt.s32.totalorder %v3175_v61, 1  ;;  %vm1697_vm14 = vcmp.lt.s32.totalorder %v3175_v61, 2 }
 0x13b   :  { %v3189_v29 = vshll.u32 %v1672_v45, 8  ;;  %vm1343_vm15 = vcmp.lt.s32.totalorder %v3163_v26, 2  ;;  %v1437_v47 = vsel %vm1354_vm6, %v1436_v14, %v1435_v63  ;;  %v1626_v21 = vsub.s32 0, %v3184_v24 }
 0x13c   :  { %vm1699_vm0 = vcmp.lt.s32.totalorder %v3175_v61, 4  ;;  %v1704_v25 = vsel %vm1696_vm13, %v1683_v6, %v1686_v60  ;;  %vm1340_vm1 = vweird.f32 %v2973_v0  ;;  %v1440_v30 = vsel %vm3130_vm7, %v2977_v5, %v1437_v47  ;;  %v663_v47 = vpop.f32.mrf.mxu1 }
 0x13d   :  { %vm1562_vm2 = vcmp.lt.s32.totalorder %v2983_v11, 0  ;;  %vm1698_vm3 = vcmp.lt.s32.totalorder %v3175_v61, 3  ;;  %v1701_v15 = vsel %vm1699_vm0, %v1689_v8, 2102212464  ;;  %v1705_v35 = vsel %vm1699_vm0, %v1692_v9, 920167782 }
 0x13e   :  { %2713 = vcosq.f32 %v1440_v30  ;;  %v2537_v7 = vmin.u32 %v1626_v21, %v3184_v24  ;;  %v1680_v16 = vshrl.u32 %v2781_v31, %v1679_v46  ;;  %v1706_v42 = vsel %vm1698_vm3, %v1689_v8, %v1705_v35 }
 0x13f   :  { %2715 = vsinq.f32 %v1440_v30  ;;  %v1707_v41 = vsel %vm1697_vm14, %v1704_v25, %v1706_v42  ;;  %v1708_v12 = vsel %vm1696_vm13, %v1686_v60, %v1689_v8  ;;  %v1709_v23 = vsel %vm1699_vm0, %v1695_v13, 1326507024 }
 0x140   :  { %vm3220_vm4 = vcmp.le.f32.partialorder %v1560_v28, 0.7853982  ;;  %v1628_v46 = vclz %v2537_v7  ;;  %v1700_v56 = vsel %vm1696_vm13, %v1680_v16, %v1683_v6  ;;  %v1702_v50 = vsel %vm1698_vm3, %v1686_v60, %v1701_v15 }
 0x141   :  { %v2710_v27 = vpop.eup %2709  ;;  %v3229_v44 = vadd.f32 %v661_v33, %v3068_v39  ;;  %v1710_v53 = vsel %vm1698_vm3, %v1692_v9, %v1709_v23  ;;  %v3234_v28 = vmul.u32.u64.low %v3189_v29, %v1707_v41  ;;  %v3235_v37 = vmul.u32.u64.high %v3189_v29, %v1707_v41, %v3234_v28 }
 0x142   :  { %v2712_v52 = vpop.eup %2711  ;;  %v1348_v18 = vxor.u32 2147483648, %v2710_v27  ;;  %v2538_v54 = vadd.s32 4294967294, %v1628_v46  ;;  %v1646_v19 = vsub.s32 4, %v3172_v58  ;;  %v1711_v59 = vsel %vm1697_vm14, %v1708_v12, %v1710_v53 }
 0x143   :  { %v1345_v55 = vxor.u32 2147483648, %v2712_v52  ;;  %v1446_v1 = vand.u32 3, %v1445_v22  ;;  %v3244_v2 = vmul.u32.u64.low %v3189_v29, %v1711_v59  ;;  %v3245_v63 = vmul.u32.u64.high %v3189_v29, %v1711_v59, %v3244_v2 }
 0x144   :  { %v1349_v39 = vsel %vm1347_vm11, %v1348_v18, %v2712_v52  ;;  %vm2539_vm5 = vcmp.lt.s32.totalorder %v2538_v54, 0  ;;  %v1703_v6 = vsel %vm1697_vm14, %v1700_v56, %v1702_v50  ;;  %v1875_v60 = vand.u32 2139095040, %v3229_v44 }
 0x145   :  { %v1346_v3 = vsel %vm1344_vm12, %v2710_v27, %v1345_v55  ;;  %v1616_v9 = vadd.s32 %v3134_v4, %v3126_v62  ;;  %v1631_v17 = vsel %vm2539_vm5, 0, %v2538_v54  ;;  %v1722_v20 = vadd.s32 1, %v3235_v37 }
 0x146   :  { %v1350_v8 = vsel %vm1343_vm15, %v1346_v3, %v1349_v39  ;;  %v1632_v22 = vsub.s32 32, %v1631_v17  ;;  %v1636_v13 = vsub.s32 4294967266, %v1631_v17  ;;  %v1647_v61 = vsel %vm1562_vm2, %v1646_v19, %v3172_v58 }
 0x147   :  { %v1351_v14 = vsel %vm1340_vm1, nan, %v1350_v8  ;;  %v1719_v26 = vmul.u32 %v3189_v29, %v1703_v6  ;;  %vm1721_vm6 = vc.u32 %v3245_v63, %v3234_v28  ;;  %v1872_v62 = vand.u32 2147483647, %v3229_v44 }
 0x148   :  { %2496 = vst [vmem:[#allocation2] sm:$0xff] %v1351_v14  ;;  %v1876_v4 = vshrl.u32 %v1875_v60, 23  ;;  %v1633_v21 = vshll.u32 %v3184_v24, %v1631_v17  ;;  %v1634_v0 = vshrl.u32 %v1616_v9, %v1632_v22  ;;  %v1637_v25 = vadd.s32 127, %v1636_v13 }
 0x149   :  { %v1723_v30 = vsel %vm1721_vm6, %v1722_v20, %v3235_v37  ;;  %v1649_v15 = vsel %vm3220_vm4, 0, %v1647_v61  ;;  %v3271_v33 = vadd.f32 %v663_v47, %v3158_v38  ;;  %vm1448_vm7 = vcmp.eq.s32.totalorder %v1446_v1, 0  ;;  %v573_v37 = vpop.f32.mrf.mxu0 }
 0x14a   :  { %v1724_v58 = vadd.s32 %v1723_v30, %v1719_v26  ;;  %v2548_v35 = vadd.s32 4294967169, %v1876_v4  ;;  %v1635_v29 = vor.u32 %v1634_v0, %v1633_v21  ;;  %v1638_v7 = vshll.u32 %v1637_v25, 23 }
 0x14b   :  { %v2714_v16 = vpop.eup %2713  ;;  %v1879_v24 = vand.u32 8388607, %v1872_v62  ;;  %vm1451_vm8 = vcmp.eq.s32.totalorder %v1446_v1, 2  ;;  %v1653_v46 = vadd.s32 3, %v1649_v15  ;;  %v1979_v38 = vand.u32 2139095040, %v3271_v33 }
 0x14c   :  { %v1725_v42 = vadd.s32 536870912, %v1724_v58  ;;  %v1882_v41 = vadd.s32 1, %v2548_v35  ;;  %v2716_v12 = vpop.eup %2715  ;;  %v1452_v23 = vxor.u32 2147483648, %v2714_v16  ;;  %v1639_v27 = vor.u32 4788187, %v1638_v7 }
 0x14d   :  { %v1449_v56 = vxor.u32 2147483648, %v2716_v12  ;;  %v1642_v53 = vcvt.s32.f32 %v1635_v29  ;;  %vm1447_vm10 = vcmp.lt.s32.totalorder %v1446_v1, 2  ;;  %v1880_v59 = vor.u32 8388608, %v1879_v24 }
 0x14e   :  { %v3275_v50 = vshrl.u32 %v1725_v42, 30  ;;  %vm1883_vm9 = vcmp.gt.s32.totalorder %v1882_v41, 0  ;;  %v1453_v52 = vsel %vm1451_vm8, %v1452_v23, %v2716_v12  ;;  %v1640_v18 = vand.u32 2147483647, %v1639_v27 }
 0x14f   :  { %v1884_v55 = vsel %vm1883_vm9, %v1882_v41, 0  ;;  %v1450_v54 = vsel %vm1448_vm7, %v2714_v16, %v1449_v56  ;;  %vm1444_vm11 = vweird.f32 %v2977_v5  ;;  %v3281_v60 = vand.u32 3, %v1653_v46 }
 0x150   :  { %v1727_v19 = vshll.u32 %v3275_v50, 30  ;;  %v1454_v39 = vsel %vm1447_vm10, %v1450_v54, %v1453_v52  ;;  %v1643_v2 = vmul.f32 %v1642_v53, %v1640_v18  ;;  %v1886_v3 = vand.u32 31, %v1884_v55 }
 0x151   :  { %v1455_v6 = vsel %vm1444_vm11, nan, %v1454_v39  ;;  %v3286_v9 = vadd.f32 %v573_v37, %v2969_v49  ;;  %v1720_v1 = vadd.s32 %v3234_v28, %v3245_v63  ;;  %v1980_v14 = vshrl.u32 %v1979_v38, 23 }
 0x152   :  { %v3283_v8 = vsub.s32 %v1724_v58, %v1727_v19  ;;  %2497 = vst [vmem:[#allocation2 + $0x8] sm:$0xff] %v1455_v6  ;;  %v1644_v17 = vxor.u32 2147483648, %v1643_v2  ;;  %v1887_v20 = vsub.s32 32, %v1886_v3  ;;  %v1885_v22 = vshrl.u32 %v1884_v55, 5 }
 0x153   :  { %v3291_v13 = vshll.u32 %v1880_v59, 8  ;;  %v1976_v61 = vand.u32 2147483647, %v3271_v33  ;;  %v1750_v49 = vsub.s32 4, %v3275_v50  ;;  %v1889_v21 = vshll.u32 %v2781_v31, %v1886_v3 }
 0x154   :  { %v1730_v5 = vsub.s32 0, %v3283_v8  ;;  %v1645_v47 = vsel %vm1562_vm2, %v1644_v17, %v1643_v2  ;;  %v1890_v26 = vshrl.u32 %v2782_v34, %v1887_v20  ;;  %v1893_v4 = vshrl.u32 %v2783_v36, %v1887_v20 }
 0x155   :  { %v1648_v28 = vsel %vm3220_vm4, %v2983_v11, %v1645_v47  ;;  %v1896_v0 = vshrl.u32 %v2784_v32, %v1887_v20  ;;  %v1892_v25 = vshll.u32 %v2782_v34, %v1886_v3  ;;  %v1895_v30 = vshll.u32 %v2783_v36, %v1886_v3 }
 0x156   :  { %v2541_v63 = vmin.u32 %v1730_v5, %v3283_v8  ;;  %2717 = vcosq.f32 %v1648_v28  ;;  %v2552_v15 = vadd.s32 4294967169, %v1980_v14  ;;  %v1891_v35 = vor.u32 %v1890_v26, %v1889_v21 }
 0x157   :  { %2719 = vsinq.f32 %v1648_v28  ;;  %vm1904_vm12 = vcmp.lt.s32.totalorder %v1885_v22, 1  ;;  %v1894_v29 = vor.u32 %v1893_v4, %v1892_v25  ;;  %v1897_v7 = vor.u32 %v1896_v0, %v1895_v30 }
 0x158   :  { %v1732_v58 = vclz %v2541_v63  ;;  %v1898_v45 = vshll.u32 %v2784_v32, %v1886_v3  ;;  %v1899_v16 = vshrl.u32 %v2785_v40, %v1887_v20  ;;  %v1888_v24 = vshrl.u32 %v2781_v31, %v1887_v20  ;;  %v668_v63 = vpop.f32.mrf.mxu1 }
 0x159   :  { %v1901_v41 = vshll.u32 %v2785_v40, %v1886_v3  ;;  %v1902_v12 = vshrl.u32 %v2786_v48, %v1887_v20  ;;  %vm1666_vm13 = vcmp.lt.s32.totalorder %v3049_v10, 0  ;;  %vm1905_vm14 = vcmp.lt.s32.totalorder %v1885_v22, 2 }
 0x15a   :  { %v2542_v42 = vadd.s32 4294967294, %v1732_v58  ;;  %v1900_v23 = vor.u32 %v1899_v16, %v1898_v45  ;;  %vm1906_vm15 = vcmp.lt.s32.totalorder %v1885_v22, 3  ;;  %vm1907_vm0 = vcmp.lt.s32.totalorder %v1885_v22, 4 }
 0x15b   :  { %v1903_v27 = vor.u32 %v1902_v12, %v1901_v41  ;;  %v1908_v46 = vsel %vm1904_vm12, %v1888_v24, %v1891_v35  ;;  %v1909_v56 = vsel %vm1907_vm0, %v1897_v7, 2102212464  ;;  %v1912_v18 = vsel %vm1904_vm12, %v1891_v35, %v1894_v29 }
 0x15c   :  { %vm2543_vm1 = vcmp.lt.s32.totalorder %v2542_v42, 0  ;;  %v1910_v52 = vsel %vm1906_vm15, %v1894_v29, %v1909_v56  ;;  %v1913_v53 = vsel %vm1907_vm0, %v1900_v23, 920167782  ;;  %vm3320_vm2 = vcmp.le.f32.partialorder %v1664_v43, 0.7853982 }
 0x15d   :  { %v1735_v38 = vsel %vm2543_vm1, 0, %v2542_v42  ;;  %v1916_v59 = vsel %vm1904_vm12, %v1894_v29, %v1897_v7  ;;  %v1911_v39 = vsel %vm1905_vm14, %v1908_v46, %v1910_v52  ;;  %v1914_v2 = vsel %vm1906_vm15, %v1897_v7, %v1913_v53 }
 0x15e   :  { %v1736_v55 = vsub.s32 32, %v1735_v38  ;;  %v1737_v54 = vshll.u32 %v3283_v8, %v1735_v38  ;;  %v1740_v19 = vsub.s32 4294967266, %v1735_v38  ;;  %v1917_v3 = vsel %vm1907_vm0, %v1903_v27, 1326507024 }
 0x15f   :  { %v1986_v6 = vadd.s32 1, %v2552_v15  ;;  %v1915_v43 = vsel %vm1905_vm14, %v1912_v18, %v1914_v2  ;;  %v1918_v14 = vsel %vm1906_vm15, %v1900_v23, %v1917_v3  ;;  %vm1652_vm3 = vweird.f32 %v2983_v11 }
 0x160   :  { %v1738_v17 = vshrl.u32 %v1720_v1, %v1736_v55  ;;  %v1741_v20 = vadd.s32 127, %v1740_v19  ;;  %v1919_v8 = vsel %vm1905_vm14, %v1916_v59, %v1918_v14  ;;  %vm1655_vm5 = vcmp.lt.s32.totalorder %v3281_v60, 2 }
 0x161   :  { %v3334_v5 = vmul.u32.u64.low %v3291_v13, %v1915_v43  ;;  %v3335_v47 = vmul.u32.u64.high %v3291_v13, %v1915_v43, %v3334_v5  ;;  %vm1987_vm4 = vcmp.gt.s32.totalorder %v1986_v6, 0  ;;  %vm1656_vm6 = vcmp.eq.s32.totalorder %v3281_v60, 0 }
 0x162   :  { %v1739_v26 = vor.u32 %v1738_v17, %v1737_v54  ;;  %v1742_v4 = vshll.u32 %v1741_v20, 23  ;;  %v3339_v28 = vmul.u32.u64.low %v3291_v13, %v1919_v8  ;;  %v3340_v1 = vmul.u32.u64.high %v3291_v13, %v1919_v8, %v3339_v28 }
 0x163   :  { %vm1659_vm7 = vcmp.eq.s32.totalorder %v3281_v60, 2  ;;  %v1988_v22 = vsel %vm1987_vm4, %v1986_v6, 0  ;;  %v2718_v21 = vpop.eup %2717  ;;  %v1751_v25 = vsel %vm1666_vm13, %v1750_v49, %v3275_v50  ;;  %v1983_v30 = vand.u32 8388607, %v1976_v61 }
 0x164   :  { %v1743_v0 = vor.u32 4788187, %v1742_v4  ;;  %v1990_v15 = vand.u32 31, %v1988_v22  ;;  %v2720_v58 = vpop.eup %2719  ;;  %v1660_v35 = vxor.u32 2147483648, %v2718_v21  ;;  %v1927_v29 = vmul.u32 %v3291_v13, %v1911_v39 }
 0x165   :  { %v1930_v7 = vadd.s32 1, %v3335_v47  ;;  %v3355_v45 = vadd.f32 %v668_v63, %v3286_v9  ;;  %v1657_v16 = vxor.u32 2147483648, %v2720_v58  ;;  %v1746_v24 = vcvt.s32.f32 %v1739_v26 }
 0x166   :  { %v1744_v42 = vand.u32 2147483647, %v1743_v0  ;;  %vm1929_vm8 = vc.u32 %v3340_v1, %v3334_v5  ;;  %v1661_v50 = vsel %vm1659_vm7, %v1660_v35, %v2720_v58  ;;  %v1753_v49 = vsel %vm3320_vm2, 0, %v1751_v25 }
 0x167   :  { %v1931_v41 = vsel %vm1929_vm8, %v1930_v7, %v3335_v47  ;;  %v1991_v13 = vsub.s32 32, %v1990_v15  ;;  %v1658_v12 = vsel %vm1656_vm6, %v2718_v21, %v1657_v16  ;;  %v1984_v27 = vor.u32 8388608, %v1983_v30 }
 0x168   :  { %v1747_v9 = vmul.f32 %v1746_v24, %v1744_v42  ;;  %v1932_v23 = vadd.s32 %v1931_v41, %v1927_v29  ;;  %v1662_v46 = vsel %vm1655_vm5, %v1658_v12, %v1661_v50  ;;  %v1993_v56 = vshll.u32 %v2781_v31, %v1990_v15 }
 0x169   :  { %v1994_v38 = vshrl.u32 %v2782_v34, %v1991_v13  ;;  %v1997_v52 = vshrl.u32 %v2783_v36, %v1991_v13  ;;  %v1663_v18 = vsel %vm1652_vm3, nan, %v1662_v46  ;;  %v1989_v54 = vshrl.u32 %v1988_v22, 5 }
 0x16a   :  { %v1748_v53 = vxor.u32 2147483648, %v1747_v9  ;;  %v1933_v55 = vadd.s32 536870912, %v1932_v23  ;;  %2499 = vst [vmem:[#allocation2 + $0x18] sm:$0xff] %v1663_v18  ;;  %v1996_v59 = vshll.u32 %v2782_v34, %v1990_v15  ;;  %v1999_v39 = vshll.u32 %v2783_v36, %v1990_v15 }
 0x16b   :  { %v1995_v19 = vor.u32 %v1994_v38, %v1993_v56  ;;  %v2000_v60 = vshrl.u32 %v2784_v32, %v1991_v13  ;;  %v2002_v6 = vshll.u32 %v2784_v32, %v1990_v15  ;;  %v2003_v11 = vshrl.u32 %v2785_v40, %v1991_v13 }
 0x16c   :  { %v1749_v2 = vsel %vm1666_vm13, %v1748_v53, %v1747_v9  ;;  %v3378_v3 = vshrl.u32 %v1933_v55, 30  ;;  %v1998_v20 = vor.u32 %v1997_v52, %v1996_v59  ;;  %v2005_v43 = vshll.u32 %v2785_v40, %v1990_v15 }
 0x16d   :  { %v1752_v17 = vsel %vm3320_vm2, %v3049_v10, %v1749_v2  ;;  %v2006_v14 = vshrl.u32 %v2786_v48, %v1991_v13  ;;  %v2001_v47 = vor.u32 %v2000_v60, %v1999_v39  ;;  %v2004_v26 = vor.u32 %v2003_v11, %v2002_v6 }
 0x16e   :  { %2721 = vcosq.f32 %v1752_v17  ;;  %v1935_v8 = vshll.u32 %v3378_v3, 30  ;;  %v1757_v28 = vadd.s32 3, %v1753_v49  ;;  %vm2008_vm9 = vcmp.lt.s32.totalorder %v1989_v54, 1 }
 0x16f   :  { %2723 = vsinq.f32 %v1752_v17  ;;  %v2007_v4 = vor.u32 %v2006_v14, %v2005_v43  ;;  %vm2011_vm10 = vcmp.lt.s32.totalorder %v1989_v54, 4  ;;  %vm2010_vm11 = vcmp.lt.s32.totalorder %v1989_v54, 3 }
 0x170   :  { %v3388_v63 = vsub.s32 %v1932_v23, %v1935_v8  ;;  %v2016_v37 = vsel %vm2008_vm9, %v1995_v19, %v1998_v20  ;;  %v2017_v22 = vsel %vm2011_vm10, %v2004_v26, 920167782  ;;  %v2187_v21 = vand.u32 2139095040, %v3355_v45 }
 0x171   :  { %vm2009_vm12 = vcmp.lt.s32.totalorder %v1989_v54, 2  ;;  %v2018_v25 = vsel %vm2010_vm11, %v2001_v47, %v2017_v22  ;;  %v2024_v30 = vshll.u32 %v1984_v27, 8  ;;  %v2013_v15 = vsel %vm2011_vm10, %v2001_v47, 2102212464 }
 0x172   :  { %v1938_v0 = vsub.s32 0, %v3388_v63  ;;  %v2019_v58 = vsel %vm2009_vm12, %v2016_v37, %v2018_v25  ;;  %v2020_v35 = vsel %vm2008_vm9, %v1998_v20, %v2001_v47  ;;  %v2021_v29 = vsel %vm2011_vm10, %v2007_v4, 1326507024  ;;  %v575_v37 = vpop.f32.mrf.mxu0 }
 0x173   :  { %v1758_v7 = vand.u32 3, %v1757_v28  ;;  %v1992_v42 = vshrl.u32 %v2781_v31, %v1991_v13  ;;  %v2022_v24 = vsel %vm2010_vm11, %v2004_v26, %v2021_v29  ;;  %v2188_v12 = vshrl.u32 %v2187_v21, 23 }
 0x174   :  { %v2549_v16 = vmin.u32 %v1938_v0, %v3388_v63  ;;  %v2023_v50 = vsel %vm2009_vm12, %v2020_v35, %v2022_v24  ;;  %v3400_v49 = vmul.u32.u64.low %v2024_v30, %v2019_v58  ;;  %v3401_v41 = vmul.u32.u64.high %v2024_v30, %v2019_v58, %v3400_v49 }
 0x175   :  { %v2012_v23 = vsel %vm2008_vm9, %v1992_v42, %v1995_v19  ;;  %v2014_v27 = vsel %vm2010_vm11, %v1998_v20, %v2013_v15  ;;  %v3406_v46 = vmul.u32.u64.low %v2024_v30, %v2023_v50  ;;  %v3407_v56 = vmul.u32.u64.high %v2024_v30, %v2023_v50, %v3406_v46 }
 0x176   :  { %v1940_v9 = vclz %v2549_v16  ;;  %v2560_v38 = vadd.s32 4294967169, %v2188_v12  ;;  %vm1756_vm13 = vweird.f32 %v3049_v10  ;;  %vm1759_vm14 = vcmp.lt.s32.totalorder %v1758_v7, 2 }
 0x177   :  { %vm1874_vm15 = vcmp.lt.s32.totalorder %v3229_v44, 0  ;;  %vm1760_vm0 = vcmp.eq.s32.totalorder %v1758_v7, 0  ;;  %v2015_v52 = vsel %vm2009_vm12, %v2012_v23, %v2014_v27  ;;  %v2034_v18 = vadd.s32 1, %v3401_v41 }
 0x178   :  { %v2550_v13 = vadd.s32 4294967294, %v1940_v9  ;;  %v2194_v53 = vadd.s32 1, %v2560_v38  ;;  %vm1763_vm1 = vcmp.eq.s32.totalorder %v1758_v7, 2  ;;  %v1928_v55 = vadd.s32 %v3334_v5, %v3340_v1 }
 0x179   :  { %v2184_v19 = vand.u32 2147483647, %v3355_v45  ;;  %v1958_v60 = vsub.s32 4, %v3378_v3  ;;  %vm2033_vm3 = vc.u32 %v3407_v56, %v3400_v49  ;;  %v2031_v17 = vmul.u32 %v2024_v30, %v2015_v52 }
 0x17a   :  { %vm2551_vm2 = vcmp.lt.s32.totalorder %v2550_v13, 0  ;;  %vm2195_vm4 = vcmp.gt.s32.totalorder %v2194_v53, 0  ;;  %v2035_v5 = vsel %vm2033_vm3, %v2034_v18, %v3401_v41  ;;  %vm3433_vm5 = vcmp.le.f32.partialorder %v1872_v62, 0.7853982 }
 0x17b   :  { %v2722_v59 = vpop.eup %2721  ;;  %v1943_v39 = vsel %vm2551_vm2, 0, %v2550_v13  ;;  %v2196_v1 = vsel %vm2195_vm4, %v2194_v53, 0  ;;  %v2036_v26 = vadd.s32 %v2035_v5, %v2031_v17  ;;  %v1959_v28 = vsel %vm1874_vm15, %v1958_v60, %v3378_v3  ;;  %v670_v53 = vpop.f32.mrf.mxu1 }
 0x17c   :  { %v2724_v54 = vpop.eup %2723  ;;  %v1764_v2 = vxor.u32 2147483648, %v2722_v59  ;;  %v1944_v6 = vsub.s32 32, %v1943_v39  ;;  %v1948_v11 = vsub.s32 4294967266, %v1943_v39  ;;  %v1945_v43 = vshll.u32 %v3388_v63, %v1943_v39 }
 0x17d   :  { %v1761_v20 = vxor.u32 2147483648, %v2724_v54  ;;  %v2191_v22 = vand.u32 8388607, %v2184_v19  ;;  %v2198_v21 = vand.u32 31, %v2196_v1  ;;  %v2037_v30 = vadd.s32 536870912, %v2036_v26 }
 0x17e   :  { %v1765_v14 = vsel %vm1763_vm1, %v1764_v2, %v2724_v54  ;;  %v1946_v8 = vshrl.u32 %v1928_v55, %v1944_v6  ;;  %v1949_v47 = vadd.s32 127, %v1948_v11  ;;  %v1961_v29 = vsel %vm3433_vm5, 0, %v1959_v28 }
 0x17f   :  { %v1762_v4 = vsel %vm1760_vm0, %v2722_v59, %v1761_v20  ;;  %v2199_v3 = vsub.s32 32, %v2198_v21  ;;  %v576_v7 = vadd.f32 %v575_v37, %v2971_v57  ;;  %v3440_v16 = vshrl.u32 %v2037_v30, 30 }
 0x180   :  { %v1766_v63 = vsel %vm1759_vm14, %v1762_v4, %v1765_v14  ;;  %v1947_v0 = vor.u32 %v1946_v8, %v1945_v43  ;;  %v1950_v25 = vshll.u32 %v1949_v47, 23  ;;  %v2192_v42 = vor.u32 8388608, %v2191_v22  ;;  %v3469_v8 = vpop.f32.mrf.mxu0 }
 0x181   :  { %v1767_v15 = vsel %vm1756_vm13, nan, %v1766_v63  ;;  %v3442_v24 = vshrl.u32 %v2196_v1, 5  ;;  %v2202_v10 = vshrl.u32 %v2782_v34, %v2199_v3  ;;  %v2205_v62 = vshrl.u32 %v2783_v36, %v2199_v3 }
 0x182   :  { %2500 = vst [vmem:[#allocation2 + $0x20] sm:$0xff] %v1767_v15  ;;  %v1951_v35 = vor.u32 4788187, %v1950_v25  ;;  %v1954_v41 = vcvt.s32.f32 %v1947_v0  ;;  %v2039_v12 = vshll.u32 %v3440_v16, 30  ;;  %v2208_v9 = vshrl.u32 %v2784_v32, %v2199_v3 }
 0x183   :  { %v2201_v23 = vshll.u32 %v2781_v31, %v2198_v21  ;;  %v2204_v27 = vshll.u32 %v2782_v34, %v2198_v21  ;;  %v2210_v57 = vshll.u32 %v2784_v32, %v2198_v21  ;;  %v2211_v46 = vshrl.u32 %v2785_v40, %v2199_v3 }
 0x184   :  { %v1952_v50 = vand.u32 2147483647, %v1951_v35  ;;  %v1965_v13 = vadd.s32 3, %v1961_v29  ;;  %v3452_v52 = vsub.s32 %v2036_v26, %v2039_v12  ;;  %v2207_v18 = vshll.u32 %v2783_v36, %v2198_v21 }
 0x185   :  { %v2203_v55 = vor.u32 %v2202_v10, %v2201_v23  ;;  %v2206_v59 = vor.u32 %v2205_v62, %v2204_v27  ;;  %v2212_v39 = vor.u32 %v2211_v46, %v2210_v57  ;;  %v2214_v60 = vshrl.u32 %v2786_v48, %v2199_v3 }
 0x186   :  { %v1955_v38 = vmul.f32 %v1954_v41, %v1952_v50  ;;  %vm1978_vm6 = vcmp.lt.s32.totalorder %v3271_v33, 0  ;;  %v2042_v2 = vsub.s32 0, %v3452_v52  ;;  %v2209_v6 = vor.u32 %v2208_v9, %v2207_v18 }
 0x187   :  { %v2213_v11 = vshll.u32 %v2785_v40, %v2198_v21  ;;  %v2200_v17 = vshrl.u32 %v2781_v31, %v2199_v3  ;;  %vm2216_vm7 = vcmp.lt.s32.totalorder %v3442_v24, 1  ;;  %v3461_v20 = vshll.u32 %v2192_v42, 8  ;;  %v3482_v21 = vpop.f32.mrf.mxu1  ;;  %v3493_v3 = vpop.f32.mrf.mxu0 }
 0x188   :  { %v1956_v54 = vxor.u32 2147483648, %v1955_v38  ;;  %v3463_v43 = vadd.f32 %v670_v53, %v576_v7  ;;  %v2553_v1 = vmin.u32 %v2042_v2, %v3452_v52  ;;  %vm2219_vm8 = vcmp.lt.s32.totalorder %v3442_v24, 4 }
 0x189   :  { %v2215_v14 = vor.u32 %v2214_v60, %v2213_v11  ;;  %v2062_v26 = vsub.s32 4, %v3440_v16  ;;  %v2224_v4 = vsel %vm2216_vm7, %v2203_v55, %v2206_v59  ;;  %v2225_v28 = vsel %vm2219_vm8, %v2212_v39, 920167782  ;;  %v3505_v41 = vpop.f32.mrf.mxu1 }
 0x18a   :  { %v1957_v5 = vsel %vm1874_vm15, %v1956_v54, %v1955_v38  ;;  %v2044_v37 = vclz %v2553_v1  ;;  %vm2218_vm9 = vcmp.lt.s32.totalorder %v3442_v24, 3  ;;  %v2221_v22 = vsel %vm2219_vm8, %v2209_v6, 2102212464  ;;  %v3516_v38 = vpop.f32.mrf.mxu0 }
 0x18b   :  { %v1960_v47 = vsel %vm3433_vm5, %v3229_v44, %v1957_v5  ;;  %vm2217_vm10 = vcmp.lt.s32.totalorder %v3442_v24, 2  ;;  %v2220_v63 = vsel %vm2216_vm7, %v2200_v17, %v2203_v55  ;;  %v2226_v0 = vsel %vm2218_vm9, %v2209_v6, %v2225_v28  ;;  %v3527_v54 = vpop.f32.mrf.mxu1 }
 0x18c   :  { %2725 = vcosq.f32 %v1960_v47  ;;  %v2554_v25 = vadd.s32 4294967294, %v2044_v37  ;;  %v2227_v30 = vsel %vm2217_vm10, %v2224_v4, %v2226_v0  ;;  %v2228_v15 = vsel %vm2216_vm7, %v2206_v59, %v2209_v6  ;;  %v3536_v17 = vpop.f32.mrf.mxu0 }
 0x18d   :  { %2727 = vsinq.f32 %v1960_v47  ;;  %v2229_v58 = vsel %vm2219_vm8, %v2215_v14, 1326507024  ;;  %v2222_v35 = vsel %vm2218_vm9, %v2206_v59, %v2221_v22  ;;  %v2032_v10 = vadd.s32 %v3400_v49, %v3407_v56  ;;  %v3544_v47 = vpop.f32.mrf.mxu1 }
 0x18e   :  { %v2230_v29 = vsel %vm2218_vm9, %v2212_v39, %v2229_v58  ;;  %v3496_v7 = vmul.u32.u64.low %v3461_v20, %v2227_v30  ;;  %v3497_v42 = vmul.u32.u64.high %v3461_v20, %v2227_v30, %v3496_v7  ;;  %vm2555_vm11 = vcmp.lt.s32.totalorder %v2554_v25, 0  ;;  %v2622_v58 = vpop.f32.mrf.mxu0 }
 0x18f   :  { %v2231_v62 = vsel %vm2217_vm10, %v2228_v15, %v2230_v29  ;;  %v2291_v50 = vand.u32 2139095040, %v3463_v43  ;;  %v2047_v12 = vsel %vm2555_vm11, 0, %v2554_v25  ;;  %v2063_v9 = vsel %vm1978_vm6, %v2062_v26, %v3440_v16 }
 0x190   :  { %v3511_v23 = vmul.u32.u64.low %v3461_v20, %v2231_v62  ;;  %v3512_v27 = vmul.u32.u64.high %v3461_v20, %v2231_v62, %v3511_v23  ;;  %v2048_v57 = vsub.s32 32, %v2047_v12  ;;  %v2052_v46 = vsub.s32 4294967266, %v2047_v12 }
 0x191   :  { %v2223_v49 = vsel %vm2217_vm10, %v2220_v63, %v2222_v35  ;;  %v2292_v56 = vshrl.u32 %v2291_v50, 23  ;;  %v1966_v18 = vand.u32 3, %v1965_v13  ;;  %vm3520_vm12 = vcmp.le.f32.partialorder %v1976_v61, 0.7853982 }
 0x192   :  { %v2242_v16 = vadd.s32 1, %v3497_v42  ;;  %v33_v55 = vsub.s32 2, %v2958_v51  ;;  %v2049_v59 = vshll.u32 %v3452_v52, %v2047_v12  ;;  %v2050_v39 = vshrl.u32 %v2032_v10, %v2048_v57  ;;  %v3552_v12 = vpop.f32.mrf.mxu1 }
 0x193   :  { %v2053_v60 = vadd.s32 127, %v2052_v46  ;;  %v2564_v24 = vadd.s32 4294967169, %v2292_v56  ;;  %v2065_v13 = vsel %vm3520_vm12, 0, %v2063_v9  ;;  %v2239_v2 = vmul.u32 %v3461_v20, %v2223_v49  ;;  %v2757_v20 = vld [vmem:[%s3970_s2] sm:$0x7]  ;;  %s2787_s2 = smov [#allocation2]  }
 0x194   :  { %vm2241_vm13 = vc.u32 %v3512_v27, %v3496_v7  ;;  %v2288_v61 = vand.u32 2147483647, %v3463_v43  ;;  %v2051_v6 = vor.u32 %v2050_v39, %v2049_v59  ;;  %vm1964_vm14 = vweird.f32 %v3229_v44  ;;  %s2513_s26 = sshll.u32 %s2787_s2, 4  ;;  %s2514_s26 = int_to_ptr.vmem [resolvable:$true] %s2513_s26 }
 0x195   :  { %v2054_v11 = vshll.u32 %v2053_v60, 23  ;;  %v2243_v51 = vsel %vm2241_vm13, %v2242_v16, %v3497_v42  ;;  %v2298_v52 = vadd.s32 1, %v2564_v24  ;;  %vm1967_vm15 = vcmp.lt.s32.totalorder %v1966_v18, 2  ;;  %s2758_s27 = scalar_lea.vmem %s2514_s26, 1536  ;;  %p2763_p1 = scmp.lt.s32.totalorder %s2514_s26, %s2514_s26 }
 0x196   :  { %v2244_v5 = vadd.s32 %v2243_v51, %v2239_v2  ;;  %v3542_v14 = vrot.slane %v2757_v20, %v33_v55  ;;  %v2069_v4 = vadd.s32 3, %v2065_v13  ;;  %v2295_v37 = vand.u32 8388607, %v2288_v61  ;;  %p2759_p0 = scmp.ne.s32.totalorder %s2514_s26, %s2758_s27  ;;  %p2764_p2 = scmp.lt.s32.totalorder %s2758_s27, %s2758_s27 }
 0x197   :  { %v2055_v1 = vor.u32 4788187, %v2054_v11  ;;  %vm2299_vm0 = vcmp.gt.s32.totalorder %v2298_v52, 0  ;;  %v2058_v30 = vcvt.s32.f32 %v2051_v6  ;;  %vm1968_vm1 = vcmp.eq.s32.totalorder %v1966_v18, 0 }
 0x198   :  { %v2245_v28 = vadd.s32 536870912, %v2244_v5  ;;  %v2300_v22 = vsel %vm2299_vm0, %v2298_v52, 0  ;;  %vm1971_vm2 = vcmp.eq.s32.totalorder %v1966_v18, 2  ;;  %v756_v62 = vadd.f32 %v3469_v8, %v3542_v14  ;;  %v943_v8 = vpop.f32.mrf.mxu0  ;;  %p2765_p3 = por %p2764_p2, %p2763_p1 }
 0x199   :  { %v2726_v26 = vpop.eup %2725  ;;  %v2056_v25 = vand.u32 2147483647, %v2055_v1  ;;  %v2302_v15 = vand.u32 31, %v2300_v22  ;;  %v3554_v23 = vand.u32 3, %v2069_v4  ;;  %v2296_v46 = vor.u32 8388608, %v2295_v37 }
 0x19a   :  { %v2728_v63 = vpop.eup %2727  ;;  %v1972_v0 = vxor.u32 2147483648, %v2726_v26  ;;  %v3548_v29 = vshrl.u32 %v2245_v28, 30  ;;  %v3560_v16 = vadd.s32 %v3496_v7, %v3512_v27  ;;  %v746_v55 = vadd.f32 %v3493_v3, %v3542_v14  ;;  %v3574_v3 = vpop.f32.mrf.mxu1  ;;  %p2766_p4 = pnand %p2765_p3, %p2759_p0 }
 0x19b   :  { %v1969_v35 = vxor.u32 2147483648, %v2728_v63  ;;  %v2059_v10 = vmul.f32 %v2058_v30, %v2056_v25  ;;  %v2303_v50 = vsub.s32 32, %v2302_v15  ;;  %v2301_v13 = vshrl.u32 %v2300_v22, 5 }
 0x19c   :  { %v1973_v42 = vsel %vm1971_vm2, %v1972_v0, %v2728_v63  ;;  %v2247_v57 = vshll.u32 %v3548_v29, 30  ;;  %v2305_v7 = vshll.u32 %v2781_v31, %v2302_v15  ;;  %v858_v27 = vadd.f32 %v3482_v21, %v756_v62  ;;  %v3585_v21 = vpop.f32.mrf.mxu0  ;;  %v3590_v22 = vpop.f32.mrf.mxu1 }
 0x19d   :  { %v1970_v9 = vsel %vm1968_vm1, %v2726_v26, %v1969_v35  ;;  %v2060_v56 = vxor.u32 2147483648, %v2059_v10  ;;  %v2306_v60 = vshrl.u32 %v2782_v34, %v2303_v50  ;;  %v2309_v24 = vshrl.u32 %v2783_v36, %v2303_v50 }
 0x19e   :  { %v1974_v49 = vsel %vm1967_vm15, %v1970_v9, %v1973_v42  ;;  %v3566_v39 = vsub.s32 %v2244_v5, %v2247_v57  ;;  %v2308_v6 = vshll.u32 %v2782_v34, %v2302_v15  ;;  %v2311_v11 = vshll.u32 %v2783_v36, %v2302_v15 }
 0x19f   :  { %v1975_v59 = vsel %vm1964_vm14, nan, %v1974_v49  ;;  %v2061_v18 = vsel %vm1978_vm6, %v2060_v56, %v2059_v10  ;;  %v2312_v51 = vshrl.u32 %v2784_v32, %v2303_v50  ;;  %v2314_v52 = vshll.u32 %v2784_v32, %v2302_v15  ;;  %v3596_v10 = vpop.f32.mrf.mxu0 }
 0x1a0   :  { %2502 = vst [vmem:[#allocation2 + $0x30] sm:$0xff] %v1975_v59  ;;  %v2064_v44 = vsel %vm3520_vm12, %v3271_v33, %v2061_v18  ;;  %v2250_v2 = vsub.s32 0, %v3566_v39  ;;  %v2315_v5 = vshrl.u32 %v2785_v40, %v2303_v50  ;;  %v2307_v53 = vor.u32 %v2306_v60, %v2305_v7 }
 0x1a1   :  { %2729 = vcosq.f32 %v2064_v44  ;;  %v2310_v20 = vor.u32 %v2309_v24, %v2308_v6  ;;  %v2313_v26 = vor.u32 %v2312_v51, %v2311_v11  ;;  %v2317_v28 = vshll.u32 %v2785_v40, %v2302_v15  ;;  %v2638_v18 = vpop.f32.mrf.mxu0 }
 0x1a2   :  { %2731 = vsinq.f32 %v2064_v44  ;;  %v2561_v1 = vmin.u32 %v2250_v2, %v3566_v39  ;;  %v2316_v4 = vor.u32 %v2315_v5, %v2314_v52  ;;  %v2318_v37 = vshrl.u32 %v2786_v48, %v2303_v50 }
 0x1a3   :  { %v3592_v0 = vshll.u32 %v2296_v46, 8  ;;  %v852_v25 = vadd.f32 %v3505_v41, %v746_v55  ;;  %v951_v30 = vadd.f32 %v2622_v58, %v858_v27  ;;  %v2304_v35 = vshrl.u32 %v2781_v31, %v2303_v50  ;;  %v3598_v46 = vpop.f32.mrf.mxu1 }
 0x1a4   :  { %v2252_v63 = vclz %v2561_v1  ;;  %v2319_v42 = vor.u32 %v2318_v37, %v2317_v28  ;;  %vm2320_vm3 = vcmp.lt.s32.totalorder %v2301_v13, 1  ;;  %vm2323_vm4 = vcmp.lt.s32.totalorder %v2301_v13, 4 }
 0x1a5   :  { %vm2321_vm5 = vcmp.lt.s32.totalorder %v2301_v13, 2  ;;  %v2325_v15 = vsel %vm2323_vm4, %v2313_v26, 2102212464  ;;  %v2328_v9 = vsel %vm2320_vm3, %v2307_v53, %v2310_v20  ;;  %vm2322_vm6 = vcmp.lt.s32.totalorder %v2301_v13, 3  ;;  %v2646_v5 = vpop.f32.mrf.mxu1 }
 0x1a6   :  { %v2562_v62 = vadd.s32 4294967294, %v2252_v63  ;;  %v2329_v57 = vsel %vm2323_vm4, %v2316_v4, 920167782  ;;  %v2332_v49 = vsel %vm2320_vm3, %v2310_v20, %v2313_v26  ;;  %v2333_v56 = vsel %vm2323_vm4, %v2319_v42, 1326507024 }
 0x1a7   :  { %v2324_v41 = vsel %vm2320_vm3, %v2304_v35, %v2307_v53  ;;  %v2330_v58 = vsel %vm2322_vm6, %v2313_v26, %v2329_v57  ;;  %v2334_v55 = vsel %vm2322_vm6, %v2316_v4, %v2333_v56  ;;  %v2326_v59 = vsel %vm2322_vm6, %v2310_v20, %v2325_v15  ;;  %v1136_v26 = vpop.f32.mrf.mxu0  ;;  %v1226_v35 = vpop.f32.mrf.mxu1 }
 0x1a8   :  { %vm2563_vm7 = vcmp.lt.s32.totalorder %v2562_v62, 0  ;;  %v2331_v60 = vsel %vm2321_vm5, %v2328_v9, %v2330_v58  ;;  %v2335_v24 = vsel %vm2321_vm5, %v2332_v49, %v2334_v55  ;;  %v944_v44 = vadd.f32 %v943_v8, %v852_v25 }
 0x1a9   :  { %v2255_v50 = vsel %vm2563_vm7, 0, %v2562_v62  ;;  %v1047_v2 = vadd.f32 %v3552_v12, %v951_v30  ;;  %vm2068_vm8 = vweird.f32 %v3271_v33  ;;  %v2327_v8 = vsel %vm2321_vm5, %v2324_v41, %v2326_v59 }
 0x1aa   :  { %v2256_v7 = vsub.s32 32, %v2255_v50  ;;  %v2260_v27 = vsub.s32 4294967266, %v2255_v50  ;;  %v3605_v6 = vmul.u32.u64.low %v3592_v0, %v2335_v24  ;;  %v3606_v11 = vmul.u32.u64.high %v3592_v0, %v2335_v24, %v3605_v6 }
 0x1ab   :  { %v3609_v51 = vmul.u32.u64.low %v3592_v0, %v2331_v60  ;;  %v3610_v52 = vmul.u32.u64.high %v3592_v0, %v2331_v60, %v3609_v51  ;;  %v2257_v1 = vshll.u32 %v3566_v39, %v2255_v50  ;;  %vm2071_vm9 = vcmp.lt.s32.totalorder %v3554_v23, 2 }
 0x1ac   :  { %v2258_v53 = vshrl.u32 %v3560_v16, %v2256_v7  ;;  %v2261_v20 = vadd.s32 127, %v2260_v27  ;;  %vm2075_vm10 = vcmp.eq.s32.totalorder %v3554_v23, 2  ;;  %vm2186_vm11 = vcmp.lt.s32.totalorder %v3355_v45, 0 }
 0x1ad   :  { %v2270_v12 = vsub.s32 4, %v3548_v29  ;;  %v1039_v63 = vadd.f32 %v3574_v3, %v944_v44  ;;  %v1143_v39 = vadd.f32 %v2638_v18, %v1047_v2  ;;  %v2343_v13 = vmul.u32 %v3592_v0, %v2327_v8 }
 0x1ae   :  { %v2730_v4 = vpop.eup %2729  ;;  %v2259_v28 = vor.u32 %v2258_v53, %v2257_v1  ;;  %v2262_v37 = vshll.u32 %v2261_v20, 23  ;;  %vm2345_vm12 = vc.u32 %v3606_v11, %v3609_v51  ;;  %v2346_v30 = vadd.s32 1, %v3610_v52 }
 0x1af   :  { %v2732_v25 = vpop.eup %2731  ;;  %v2076_v16 = vxor.u32 2147483648, %v2730_v4  ;;  %v1137_v15 = vadd.f32 %v1136_v26, %v1039_v63  ;;  %v3625_v9 = vadd.f32 %v2646_v5, %v1143_v39  ;;  %vm2072_vm13 = vcmp.eq.s32.totalorder %v3554_v23, 0 }
 0x1b0   :  { %v2073_v42 = vxor.u32 2147483648, %v2732_v25  ;;  %v2263_v62 = vor.u32 4788187, %v2262_v37  ;;  %v2266_v57 = vcvt.s32.f32 %v2259_v28  ;;  %v2347_v49 = vsel %vm2345_vm12, %v2346_v30, %v3610_v52 }
 0x1b1   :  { %v2077_v3 = vsel %vm2075_vm10, %v2076_v16, %v2732_v25  ;;  %v2348_v41 = vadd.s32 %v2347_v49, %v2343_v13  ;;  %v3631_v58 = vadd.f32 %v1226_v35, %v1137_v15  ;;  %v2271_v50 = vsel %vm2186_vm11, %v2270_v12, %v3548_v29 }
 0x1b2   :  { %v2074_v0 = vsel %vm2072_vm13, %v2730_v4, %v2073_v42  ;;  %v2264_v56 = vand.u32 2147483647, %v2263_v62  ;;  %v1768_v59 = vand.u32 2147483647, %v3625_v9  ;;  %v1771_v60 = vand.u32 2139095040, %v3625_v9 }
 0x1b3   :  { %v2078_v55 = vsel %vm2071_vm9, %v2074_v0, %v2077_v3  ;;  %v2349_v7 = vadd.s32 536870912, %v2348_v41  ;;  %vm2185_vm14 = vcmp.le.f32.partialorder %v2184_v19, 0.7853982  ;;  %v776_v23 = vadd.f32 %v3516_v38, %v3542_v14 }
 0x1b4   :  { %v2079_v24 = vsel %vm2068_vm8, nan, %v2078_v55  ;;  %v2267_v18 = vmul.f32 %v2266_v57, %v2264_v56  ;;  %v1772_v27 = vshrl.u32 %v1771_v60, 23  ;;  %v2273_v2 = vsel %vm2185_vm14, 0, %v2271_v50 }
 0x1b5   :  { %2503 = vst [vmem:[#allocation2 + $0x38] sm:$0xff] %v2079_v24  ;;  %v3646_v29 = vshrl.u32 %v2349_v7, 30  ;;  %v1459_v6 = vand.u32 2139095040, %v3631_v58  ;;  %v1775_v33 = vand.u32 8388607, %v1768_v59  ;;  %v2277_v38 = vadd.s32 3, %v2273_v2 }
 0x1b6   :  { %v2268_v44 = vxor.u32 2147483648, %v2267_v18  ;;  %v2544_v52 = vadd.s32 4294967169, %v1772_v27  ;;  %v766_v12 = vadd.f32 %v3536_v17, %v3542_v14  ;;  %v870_v26 = vadd.f32 %v3527_v54, %v776_v23 }
 0x1b7   :  { %v2351_v1 = vshll.u32 %v3646_v29, 30  ;;  %v1460_v19 = vshrl.u32 %v1459_v6, 23  ;;  %v1776_v4 = vor.u32 8388608, %v1775_v33  ;;  %v3663_v16 = vand.u32 3, %v2277_v38 }
 0x1b8   :  { %v2269_v5 = vsel %vm2186_vm11, %v2268_v44, %v2267_v18  ;;  %v1778_v20 = vadd.s32 1, %v2544_v52  ;;  %v864_v63 = vadd.f32 %v3544_v47, %v766_v12  ;;  %v965_v39 = vadd.f32 %v3585_v21, %v870_v26 }
 0x1b9   :  { %v2272_v53 = vsel %vm2185_vm14, %v3355_v45, %v2269_v5  ;;  %v3655_v8 = vsub.s32 %v2348_v41, %v2351_v1  ;;  %v2532_v28 = vadd.s32 4294967169, %v1460_v19  ;;  %v2344_v30 = vadd.s32 %v3609_v51, %v3606_v11 }
 0x1ba   :  { %2733 = vcosq.f32 %v2272_v53  ;;  %vm1779_vm15 = vcmp.gt.s32.totalorder %v1778_v20, 0  ;;  %v3669_v54 = vadd.f32 %v3596_v10, %v864_v63  ;;  %v3672_v14 = vadd.f32 %v3590_v22, %v965_v39 }
 0x1bb   :  { %2735 = vsinq.f32 %v2272_v53  ;;  %v2354_v37 = vsub.s32 0, %v3655_v8  ;;  %v1780_v25 = vsel %vm1779_vm15, %v1778_v20, 0  ;;  %v2374_v35 = vsub.s32 4, %v3646_v29 }
 0x1bc   :  { %v1782_v13 = vand.u32 31, %v1780_v25  ;;  %v3675_v42 = vshll.u32 %v1776_v4, 8  ;;  %v3677_v21 = vadd.s32 1, %v2532_v28  ;;  %v3679_v15 = vshrl.u32 %v1780_v25, 5 }
 0x1bd   :  { %v2565_v17 = vmin.u32 %v2354_v37, %v3655_v8  ;;  %vm2283_vm0 = vcmp.eq.s32.totalorder %v3663_v16, 2  ;;  %vm2280_vm1 = vcmp.eq.s32.totalorder %v3663_v16, 0  ;;  %vm2279_vm2 = vcmp.lt.s32.totalorder %v3663_v16, 2 }
 0x1be   :  { %v1783_v47 = vsub.s32 32, %v1782_v13  ;;  %v1785_v11 = vshll.u32 %v2781_v31, %v1782_v13  ;;  %v1788_v51 = vshll.u32 %v2782_v34, %v1782_v13  ;;  %v1791_v3 = vshll.u32 %v2783_v36, %v1782_v13 }
 0x1bf   :  { %v2356_v62 = vclz %v2565_v17  ;;  %v1794_v0 = vshll.u32 %v2784_v32, %v1782_v13  ;;  %v1797_v41 = vshll.u32 %v2785_v40, %v1782_v13  ;;  %vm1467_vm3 = vcmp.gt.s32.totalorder %v3677_v21, 0 }
 0x1c0   :  { %v1786_v10 = vshrl.u32 %v2782_v34, %v1783_v47  ;;  %v1789_v22 = vshrl.u32 %v2783_v36, %v1783_v47  ;;  %v1792_v57 = vshrl.u32 %v2784_v32, %v1783_v47  ;;  %v1795_v56 = vshrl.u32 %v2785_v40, %v1783_v47 }
 0x1c1   :  { %v2566_v49 = vadd.s32 4294967294, %v2356_v62  ;;  %v1798_v24 = vshrl.u32 %v2786_v48, %v1783_v47  ;;  %vm2276_vm4 = vweird.f32 %v3355_v45  ;;  %vm2290_vm5 = vcmp.lt.s32.totalorder %v3463_v43, 0 }
 0x1c2   :  { %v1787_v55 = vor.u32 %v1786_v10, %v1785_v11  ;;  %v1790_v50 = vor.u32 %v1789_v22, %v1788_v51  ;;  %v1793_v60 = vor.u32 %v1792_v57, %v1791_v3  ;;  %v1784_v18 = vshrl.u32 %v2781_v31, %v1783_v47  ;;  %v2641_v10 = vpop.f32.mrf.mxu0 }
 0x1c3   :  { %vm2567_vm6 = vcmp.lt.s32.totalorder %v2566_v49, 0  ;;  %v1796_v7 = vor.u32 %v1795_v56, %v1794_v0  ;;  %vm1800_vm7 = vcmp.lt.s32.totalorder %v3679_v15, 1  ;;  %v1799_v27 = vor.u32 %v1798_v24, %v1797_v41 }
 0x1c4   :  { %v2359_v23 = vsel %vm2567_vm6, 0, %v2566_v49  ;;  %vm1801_vm8 = vcmp.lt.s32.totalorder %v3679_v15, 2  ;;  %vm1802_vm9 = vcmp.lt.s32.totalorder %v3679_v15, 3  ;;  %vm1803_vm10 = vcmp.lt.s32.totalorder %v3679_v15, 4 }
 0x1c5   :  { %v2360_v44 = vsub.s32 32, %v2359_v23  ;;  %v2361_v2 = vshll.u32 %v3655_v8, %v2359_v23  ;;  %v2364_v6 = vsub.s32 4294967266, %v2359_v23  ;;  %v1804_v33 = vsel %vm1800_vm7, %v1784_v18, %v1787_v55 }
 0x1c6   :  { %v1805_v5 = vsel %vm1803_vm10, %v1793_v60, 2102212464  ;;  %v1808_v1 = vsel %vm1800_vm7, %v1787_v55, %v1790_v50  ;;  %v1809_v19 = vsel %vm1803_vm10, %v1796_v7, 920167782  ;;  %v1812_v26 = vsel %vm1800_vm7, %v1790_v50, %v1793_v60 }
 0x1c7   :  { %v2734_v52 = vpop.eup %2733  ;;  %v2362_v20 = vshrl.u32 %v2344_v30, %v2360_v44  ;;  %v2365_v12 = vadd.s32 127, %v2364_v6  ;;  %v1806_v4 = vsel %vm1802_vm9, %v1790_v50, %v1805_v5  ;;  %v1810_v28 = vsel %vm1802_vm9, %v1793_v60, %v1809_v19  ;;  %v2649_v50 = vpop.f32.mrf.mxu1 }
 0x1c8   :  { %v2736_v53 = vpop.eup %2735  ;;  %v2284_v38 = vxor.u32 2147483648, %v2734_v52  ;;  %v1813_v37 = vsel %vm1803_vm10, %v1799_v27, 1326507024  ;;  %v1811_v13 = vsel %vm1801_vm8, %v1808_v1, %v1810_v28  ;;  %v1456_v3 = vand.u32 2147483647, %v3631_v58 }
 0x1c9   :  { %v2281_v8 = vxor.u32 2147483648, %v2736_v53  ;;  %v2363_v39 = vor.u32 %v2362_v20, %v2361_v2  ;;  %v2366_v25 = vshll.u32 %v2365_v12, 23  ;;  %v1814_v17 = vsel %vm1802_vm9, %v1796_v7, %v1813_v37 }
 0x1ca   :  { %v2285_v63 = vsel %vm2283_vm0, %v2284_v38, %v2736_v53  ;;  %v3722_v47 = vmul.u32.u64.low %v3675_v42, %v1811_v13  ;;  %v3723_v62 = vmul.u32.u64.high %v3675_v42, %v1811_v13, %v3722_v47  ;;  %v1815_v22 = vsel %vm1801_vm8, %v1812_v26, %v1814_v17 }
 0x1cb   :  { %v2282_v30 = vsel %vm2280_vm1, %v2734_v52, %v2281_v8  ;;  %v2367_v51 = vor.u32 4788187, %v2366_v25  ;;  %v2375_v49 = vsel %vm2290_vm5, %v2374_v35, %v3646_v29  ;;  %v2370_v41 = vcvt.s32.f32 %v2363_v39 }
 0x1cc   :  { %v2286_v11 = vsel %vm2279_vm2, %v2282_v30, %v2285_v63  ;;  %v3739_v0 = vmul.u32.u64.low %v3675_v42, %v1815_v22  ;;  %v3740_v16 = vmul.u32.u64.high %v3675_v42, %v1815_v22, %v3739_v0  ;;  %v1807_v55 = vsel %vm1801_vm8, %v1804_v33, %v1806_v4 }
 0x1cd   :  { %v2287_v57 = vsel %vm2276_vm4, nan, %v2286_v11  ;;  %v2368_v56 = vand.u32 2147483647, %v2367_v51  ;;  %v1468_v45 = vsel %vm1467_vm3, %v3677_v21, 0  ;;  %vm3749_vm11 = vcmp.le.f32.partialorder %v2288_v61, 0.7853982  ;;  %v1148_v0 = vpop.f32.mrf.mxu0 }
 0x1ce   :  { %2505 = vst [vmem:[#allocation2 + $0x48] sm:$0xff] %v2287_v57  ;;  %v1155_v29 = vadd.f32 %v2641_v10, %v3672_v14  ;;  %v1826_v35 = vadd.s32 1, %v3723_v62  ;;  %v1470_v24 = vand.u32 31, %v1468_v45  ;;  %v2377_v15 = vsel %vm3749_vm11, 0, %v2375_v49 }
 0x1cf   :  { %v2371_v18 = vmul.f32 %v2370_v41, %v2368_v56  ;;  %v1055_v7 = vadd.f32 %v3598_v46, %v3669_v54  ;;  %v1463_v21 = vand.u32 8388607, %v1456_v3  ;;  %v1823_v61 = vmul.u32 %v3675_v42, %v1807_v55 }
 0x1d0   :  { %vm1825_vm12 = vc.u32 %v3740_v16, %v3722_v47  ;;  %v1471_v23 = vsub.s32 32, %v1470_v24  ;;  %v3764_v14 = vadd.f32 %v2649_v50, %v1155_v29  ;;  %v1473_v2 = vshll.u32 %v2781_v31, %v1470_v24 }
 0x1d1   :  { %v2372_v27 = vxor.u32 2147483648, %v2371_v18  ;;  %v1827_v44 = vsel %vm1825_vm12, %v1826_v35, %v3723_v62  ;;  %v1476_v6 = vshll.u32 %v2782_v34, %v1470_v24  ;;  %v1479_v42 = vshll.u32 %v2783_v36, %v1470_v24 }
 0x1d2   :  { %v1828_v52 = vadd.s32 %v1827_v44, %v1823_v61  ;;  %v1474_v46 = vshrl.u32 %v2782_v34, %v1471_v23  ;;  %v1477_v54 = vshrl.u32 %v2783_v36, %v1471_v23  ;;  %v1480_v5 = vshrl.u32 %v2784_v32, %v1471_v23  ;;  %v1238_v61 = vpop.f32.mrf.mxu1 }
 0x1d3   :  { %v2373_v33 = vsel %vm2290_vm5, %v2372_v27, %v2371_v18  ;;  %v1482_v1 = vshll.u32 %v2784_v32, %v1470_v24  ;;  %v1483_v19 = vshrl.u32 %v2785_v40, %v1471_v23  ;;  %v1469_v20 = vshrl.u32 %v1468_v45, 5 }
 0x1d4   :  { %v2376_v53 = vsel %vm3749_vm11, %v3463_v43, %v2373_v33  ;;  %v1829_v38 = vadd.s32 536870912, %v1828_v52  ;;  %v1475_v12 = vor.u32 %v1474_v46, %v1473_v2  ;;  %v1478_v26 = vor.u32 %v1477_v54, %v1476_v6 }
 0x1d5   :  { %2737 = vcosq.f32 %v2376_v53  ;;  %v1481_v8 = vor.u32 %v1480_v5, %v1479_v42  ;;  %v1484_v4 = vor.u32 %v1483_v19, %v1482_v1  ;;  %v1485_v37 = vshll.u32 %v2785_v40, %v1470_v24 }
 0x1d6   :  { %2739 = vsinq.f32 %v2376_v53  ;;  %v3780_v28 = vshrl.u32 %v1829_v38, 30  ;;  %v1486_v63 = vshrl.u32 %v2786_v48, %v1471_v23  ;;  %v2381_v39 = vadd.s32 3, %v2377_v15 }
 0x1d7   :  { %v1464_v25 = vor.u32 8388608, %v1463_v21  ;;  %v1472_v13 = vshrl.u32 %v2781_v31, %v1471_v23  ;;  %v2395_v30 = vand.u32 2139095040, %v3764_v14  ;;  %vm1488_vm13 = vcmp.lt.s32.totalorder %v1469_v20, 1 }
 0x1d8   :  { %v1831_v17 = vshll.u32 %v3780_v28, 30  ;;  %v1487_v62 = vor.u32 %v1486_v63, %v1485_v37  ;;  %vm1491_vm14 = vcmp.lt.s32.totalorder %v1469_v20, 4  ;;  %vm1490_vm15 = vcmp.lt.s32.totalorder %v1469_v20, 3 }
 0x1d9   :  { %v1493_v11 = vsel %vm1491_vm14, %v1481_v8, 2102212464  ;;  %v1496_v51 = vsel %vm1488_vm13, %v1475_v12, %v1478_v26  ;;  %v1497_v10 = vsel %vm1491_vm14, %v1484_v4, 920167782  ;;  %vm1489_vm0 = vcmp.lt.s32.totalorder %v1469_v20, 2 }
 0x1da   :  { %v3787_v22 = vsub.s32 %v1828_v52, %v1831_v17  ;;  %v1498_v57 = vsel %vm1490_vm15, %v1481_v8, %v1497_v10  ;;  %v1500_v49 = vsel %vm1488_vm13, %v1478_v26, %v1481_v8  ;;  %v1492_v56 = vsel %vm1488_vm13, %v1472_v13, %v1475_v12 }
 0x1db   :  { %v1499_v41 = vsel %vm1489_vm0, %v1496_v51, %v1498_v57  ;;  %v1501_v55 = vsel %vm1491_vm14, %v1487_v62, 1326507024  ;;  %v1504_v45 = vshll.u32 %v1464_v25, 8  ;;  %v1494_v60 = vsel %vm1490_vm15, %v1478_v26, %v1493_v11 }
 0x1dc   :  { %v1834_v50 = vsub.s32 0, %v3787_v22  ;;  %v1502_v29 = vsel %vm1490_vm15, %v1484_v4, %v1501_v55  ;;  %v2396_v35 = vshrl.u32 %v2395_v30, 23  ;;  %v2382_v24 = vand.u32 3, %v2381_v39 }
 0x1dd   :  { %v1503_v18 = vsel %vm1489_vm0, %v1500_v49, %v1502_v29  ;;  %v3792_v15 = vmul.u32.u64.low %v1504_v45, %v1499_v41  ;;  %v3793_v21 = vmul.u32.u64.high %v1504_v45, %v1499_v41, %v3792_v15  ;;  %v1149_v27 = vadd.f32 %v1148_v0, %v1055_v7 }
 0x1de   :  { %v2545_v23 = vmin.u32 %v1834_v50, %v3787_v22  ;;  %v3797_v44 = vmul.u32.u64.low %v1504_v45, %v1503_v18  ;;  %v3798_v2 = vmul.u32.u64.high %v1504_v45, %v1503_v18, %v3797_v44  ;;  %v1495_v6 = vsel %vm1489_vm0, %v1492_v56, %v1494_v60 }
 0x1df   :  { %v2568_v52 = vadd.s32 4294967169, %v2396_v35  ;;  %vm2380_vm1 = vweird.f32 %v3463_v43  ;;  %vm1770_vm2 = vcmp.lt.s32.totalorder %v3625_v9, 0  ;;  %v3803_v54 = vadd.f32 %v1238_v61, %v1149_v27 }
 0x1e0   :  { %v1836_v46 = vclz %v2545_v23  ;;  %vm2383_vm3 = vcmp.lt.s32.totalorder %v2382_v24, 2  ;;  %vm2384_vm4 = vcmp.eq.s32.totalorder %v2382_v24, 0  ;;  %v1514_v42 = vadd.s32 1, %v3793_v21 }
 0x1e1   :  { %v2402_v33 = vadd.s32 1, %v2568_v52  ;;  %vm2387_vm5 = vcmp.eq.s32.totalorder %v2382_v24, 2  ;;  %v1511_v1 = vmul.u32 %v1504_v45, %v1495_v6  ;;  %vm1513_vm6 = vc.u32 %v3798_v2, %v3792_v15 }
 0x1e2   :  { %v2738_v5 = vpop.eup %2737  ;;  %v2546_v7 = vadd.s32 4294967294, %v1836_v46  ;;  %v1515_v38 = vsel %vm1513_vm6, %v1514_v42, %v3793_v21  ;;  %v2392_v20 = vand.u32 2147483647, %v3764_v14  ;;  %v1854_v63 = vsub.s32 4, %v3780_v28 }
 0x1e3   :  { %v2740_v19 = vpop.eup %2739  ;;  %v2388_v53 = vxor.u32 2147483648, %v2738_v5  ;;  %vm2403_vm7 = vcmp.gt.s32.totalorder %v2402_v33, 0  ;;  %v1516_v26 = vadd.s32 %v1515_v38, %v1511_v1  ;;  %vm3814_vm9 = vcmp.le.f32.partialorder %v1768_v59, 0.7853982 }
 0x1e4   :  { %v2385_v12 = vxor.u32 2147483648, %v2740_v19  ;;  %vm2547_vm8 = vcmp.lt.s32.totalorder %v2546_v7, 0  ;;  %v2404_v8 = vsel %vm2403_vm7, %v2402_v33, 0  ;;  %v1824_v30 = vadd.s32 %v3722_v47, %v3740_v16 }
 0x1e5   :  { %v2389_v4 = vsel %vm2387_vm5, %v2388_v53, %v2740_v19  ;;  %v1839_v37 = vsel %vm2547_vm8, 0, %v2546_v7  ;;  %v2406_v39 = vand.u32 31, %v2404_v8  ;;  %v1517_v51 = vadd.s32 536870912, %v1516_v26 }
 0x1e6   :  { %v2386_v25 = vsel %vm2384_vm4, %v2738_v5, %v2385_v12  ;;  %v1840_v17 = vsub.s32 32, %v1839_v37  ;;  %v1844_v62 = vsub.s32 4294967266, %v1839_v37  ;;  %v2399_v10 = vand.u32 8388607, %v2392_v20 }
 0x1e7   :  { %v2390_v11 = vsel %vm2383_vm3, %v2386_v25, %v2389_v4  ;;  %v2407_v57 = vsub.s32 32, %v2406_v39  ;;  %v1841_v59 = vshll.u32 %v3787_v22, %v1839_v37  ;;  %v1855_v47 = vsel %vm1770_vm2, %v1854_v63, %v3780_v28 }
 0x1e8   :  { %v2391_v49 = vsel %vm2380_vm1, nan, %v2390_v11  ;;  %v1842_v0 = vshrl.u32 %v1824_v30, %v1840_v17  ;;  %v1845_v56 = vadd.s32 127, %v1844_v62  ;;  %v3829_v16 = vshrl.u32 %v1517_v51, 30 }
 0x1e9   :  { %2506 = vst [vmem:[#allocation2 + $0x50] sm:$0xff] %v2391_v49  ;;  %v2409_v41 = vshll.u32 %v2781_v31, %v2406_v39  ;;  %v2410_v55 = vshrl.u32 %v2782_v34, %v2407_v57  ;;  %v2413_v43 = vshrl.u32 %v2783_v36, %v2407_v57  ;;  %v2416_v60 = vshrl.u32 %v2784_v32, %v2407_v57 }
 0x1ea   :  { %v1843_v45 = vor.u32 %v1842_v0, %v1841_v59  ;;  %v1846_v50 = vshll.u32 %v1845_v56, 23  ;;  %v1519_v22 = vshll.u32 %v3829_v16, 30  ;;  %v2400_v29 = vor.u32 8388608, %v2399_v10 }
 0x1eb   :  { %v2415_v35 = vshll.u32 %v2783_v36, %v2406_v39  ;;  %v2083_v24 = vand.u32 2139095040, %v3803_v54  ;;  %v2405_v18 = vshrl.u32 %v2404_v8, 5  ;;  %v2411_v21 = vor.u32 %v2410_v55, %v2409_v41 }
 0x1ec   :  { %v1847_v28 = vor.u32 4788187, %v1846_v50  ;;  %v2412_v61 = vshll.u32 %v2782_v34, %v2406_v39  ;;  %v3839_v23 = vsub.s32 %v1516_v26, %v1519_v22  ;;  %v2418_v44 = vshll.u32 %v2784_v32, %v2406_v39 }
 0x1ed   :  { %v2417_v27 = vor.u32 %v2416_v60, %v2415_v35  ;;  %v2419_v6 = vshrl.u32 %v2785_v40, %v2407_v57  ;;  %v1850_v46 = vcvt.s32.f32 %v1843_v45  ;;  %v2422_v33 = vshrl.u32 %v2786_v48, %v2407_v57 }
 0x1ee   :  { %v1848_v52 = vand.u32 2147483647, %v1847_v28  ;;  %v2414_v42 = vor.u32 %v2413_v43, %v2412_v61  ;;  %v1857_v5 = vsel %vm3814_vm9, 0, %v1855_v47  ;;  %v1522_v7 = vsub.s32 0, %v3839_v23 }
 0x1ef   :  { %v2420_v1 = vor.u32 %v2419_v6, %v2418_v44  ;;  %v2421_v19 = vshll.u32 %v2785_v40, %v2406_v39  ;;  %v2408_v38 = vshrl.u32 %v2781_v31, %v2407_v57  ;;  %vm2427_vm10 = vcmp.lt.s32.totalorder %v2405_v18, 4 }
 0x1f0   :  { %v1851_v53 = vmul.f32 %v1850_v46, %v1848_v52  ;;  %v2440_v12 = vshll.u32 %v2400_v29, 8  ;;  %v2533_v26 = vmin.u32 %v1522_v7, %v3839_v23  ;;  %vm2424_vm11 = vcmp.lt.s32.totalorder %v2405_v18, 1 }
 0x1f1   :  { %v2423_v8 = vor.u32 %v2422_v33, %v2421_v19  ;;  %v2429_v4 = vsel %vm2427_vm10, %v2417_v27, 2102212464  ;;  %v2432_v63 = vsel %vm2424_vm11, %v2411_v21, %v2414_v42  ;;  %v2433_v25 = vsel %vm2427_vm10, %v2420_v1, 920167782 }
 0x1f2   :  { %v1852_v37 = vxor.u32 2147483648, %v1851_v53  ;;  %v2084_v30 = vshrl.u32 %v2083_v24, 23  ;;  %v1524_v17 = vclz %v2533_v26  ;;  %vm2425_vm12 = vcmp.lt.s32.totalorder %v2405_v18, 2 }
 0x1f3   :  { %vm2426_vm13 = vcmp.lt.s32.totalorder %v2405_v18, 3  ;;  %v2428_v39 = vsel %vm2424_vm11, %v2408_v38, %v2411_v21  ;;  %v2436_v10 = vsel %vm2424_vm11, %v2414_v42, %v2417_v27  ;;  %v2437_v0 = vsel %vm2427_vm10, %v2423_v8, 1326507024 }
 0x1f4   :  { %v1853_v62 = vsel %vm1770_vm2, %v1852_v37, %v1851_v53  ;;  %v2430_v11 = vsel %vm2426_vm13, %v2414_v42, %v2429_v4  ;;  %v2434_v51 = vsel %vm2426_vm13, %v2417_v27, %v2433_v25  ;;  %v2534_v49 = vadd.s32 4294967294, %v1524_v17 }
 0x1f5   :  { %v1856_v57 = vsel %vm3814_vm9, %v3625_v9, %v1853_v62  ;;  %v2435_v59 = vsel %vm2425_vm12, %v2432_v63, %v2434_v51  ;;  %v2438_v56 = vsel %vm2426_vm13, %v2420_v1, %v2437_v0  ;;  %v1861_v55 = vadd.s32 3, %v1857_v5 }
 0x1f6   :  { %2741 = vcosq.f32 %v1856_v57  ;;  %v3859_v47 = vmul.u32.u64.low %v2440_v12, %v2435_v59  ;;  %v3860_v41 = vmul.u32.u64.high %v2440_v12, %v2435_v59, %v3859_v47  ;;  %vm2535_vm14 = vcmp.lt.s32.totalorder %v2534_v49, 0 }
 0x1f7   :  { %2743 = vsinq.f32 %v1856_v57  ;;  %v2439_v45 = vsel %vm2425_vm12, %v2436_v10, %v2438_v56  ;;  %v1527_v50 = vsel %vm2535_vm14, 0, %v2534_v49  ;;  %v2556_v60 = vadd.s32 4294967169, %v2084_v30 }
 0x1f8   :  { %v3864_v43 = vmul.u32.u64.low %v2440_v12, %v2439_v45  ;;  %v3865_v13 = vmul.u32.u64.high %v2440_v12, %v2439_v45, %v3864_v43  ;;  %v1512_v22 = vadd.s32 %v3792_v15, %v3798_v2  ;;  %v1528_v29 = vsub.s32 32, %v1527_v50 }
 0x1f9   :  { %v1532_v35 = vsub.s32 4294967266, %v1527_v50  ;;  %v2431_v24 = vsel %vm2425_vm12, %v2428_v39, %v2430_v11  ;;  %v2450_v28 = vadd.s32 1, %v3860_v41  ;;  %v2080_v21 = vand.u32 2147483647, %v3803_v54 }
 0x1fa   :  { %v2090_v61 = vadd.s32 1, %v2556_v60  ;;  %v1862_v27 = vand.u32 3, %v1861_v55  ;;  %v1529_v44 = vshll.u32 %v3839_v23, %v1527_v50  ;;  %v1530_v6 = vshrl.u32 %v1512_v22, %v1528_v29 }
 0x1fb   :  { %v1533_v52 = vadd.s32 127, %v1532_v35  ;;  %v1542_v46 = vsub.s32 4, %v3829_v16  ;;  %v2447_v42 = vmul.u32 %v2440_v12, %v2431_v24  ;;  %vm2449_vm15 = vc.u32 %v3865_v13, %v3859_v47 }
 0x1fc   :  { %vm2091_vm0 = vcmp.gt.s32.totalorder %v2090_v61, 0  ;;  %v1531_v15 = vor.u32 %v1530_v6, %v1529_v44  ;;  %v2451_v18 = vsel %vm2449_vm15, %v2450_v28, %v3860_v41  ;;  %v2087_v7 = vand.u32 8388607, %v2080_v21 }
 0x1fd   :  { %v1534_v2 = vshll.u32 %v1533_v52, 23  ;;  %v2092_v33 = vsel %vm2091_vm0, %v2090_v61, 0  ;;  %v2452_v5 = vadd.s32 %v2451_v18, %v2447_v42  ;;  %vm3881_vm1 = vcmp.le.f32.partialorder %v1456_v3, 0.7853982 }
 0x1fe   :  { %v2094_v1 = vand.u32 31, %v2092_v33  ;;  %vm1458_vm2 = vcmp.lt.s32.totalorder %v3631_v58, 0  ;;  %vm1860_vm3 = vweird.f32 %v3625_v9  ;;  %vm1863_vm4 = vcmp.lt.s32.totalorder %v1862_v27, 2 }
 0x1ff   :  { %v1535_v19 = vor.u32 4788187, %v1534_v2  ;;  %vm1864_vm5 = vcmp.eq.s32.totalorder %v1862_v27, 0  ;;  %v2453_v53 = vadd.s32 536870912, %v2452_v5  ;;  %vm1867_vm6 = vcmp.eq.s32.totalorder %v1862_v27, 2 }
 0x200   :  { %v2095_v38 = vsub.s32 32, %v2094_v1  ;;  %v1538_v26 = vcvt.s32.f32 %v1531_v15  ;;  %v1543_v8 = vsel %vm1458_vm2, %v1542_v46, %v3829_v16  ;;  %v2088_v4 = vor.u32 8388608, %v2087_v7 }
 0x201   :  { %v1536_v12 = vand.u32 2147483647, %v1535_v19  ;;  %v3890_v3 = vshrl.u32 %v2453_v53, 30  ;;  %v3892_v37 = vshrl.u32 %v2092_v33, 5  ;;  %v2097_v63 = vshll.u32 %v2781_v31, %v2094_v1 }
 0x202   :  { %v2098_v17 = vshrl.u32 %v2782_v34, %v2095_v38  ;;  %v2100_v39 = vshll.u32 %v2782_v34, %v2094_v1  ;;  %v2101_v62 = vshrl.u32 %v2783_v36, %v2095_v38  ;;  %v2103_v16 = vshll.u32 %v2783_v36, %v2094_v1 }
 0x203   :  { %v2742_v25 = vpop.eup %2741  ;;  %v1539_v30 = vmul.f32 %v1538_v26, %v1536_v12  ;;  %v2455_v10 = vshll.u32 %v3890_v3, 30  ;;  %v2104_v57 = vshrl.u32 %v2784_v32, %v2095_v38  ;;  %v2107_v0 = vshrl.u32 %v2785_v40, %v2095_v38 }
 0x204   :  { %v2744_v11 = vpop.eup %2743  ;;  %v1868_v51 = vxor.u32 2147483648, %v2742_v25  ;;  %v2110_v56 = vshrl.u32 %v2786_v48, %v2095_v38  ;;  %v2106_v34 = vshll.u32 %v2784_v32, %v2094_v1  ;;  %v2109_v45 = vshll.u32 %v2785_v40, %v2094_v1 }
 0x205   :  { %v1865_v49 = vxor.u32 2147483648, %v2744_v11  ;;  %v1540_v59 = vxor.u32 2147483648, %v1539_v30  ;;  %v2456_v55 = vsub.s32 %v2452_v5, %v2455_v10  ;;  %v2099_v43 = vor.u32 %v2098_v17, %v2097_v63 }
 0x206   :  { %v1869_v41 = vsel %vm1867_vm6, %v1868_v51, %v2744_v11  ;;  %v2102_v60 = vor.u32 %v2101_v62, %v2100_v39  ;;  %v2105_v35 = vor.u32 %v2104_v57, %v2103_v16  ;;  %v2108_v40 = vor.u32 %v2107_v0, %v2106_v34 }
 0x207   :  { %v1866_v50 = vsel %vm1864_vm5, %v2742_v25, %v1865_v49  ;;  %v1541_v36 = vsel %vm1458_vm2, %v1540_v59, %v1539_v30  ;;  %v2458_v29 = vsub.s32 0, %v2456_v55  ;;  %v2111_v24 = vor.u32 %v2110_v56, %v2109_v45 }
 0x208   :  { %v1870_v22 = vsel %vm1863_vm4, %v1866_v50, %v1869_v41  ;;  %v1544_v48 = vsel %vm3881_vm1, %v3631_v58, %v1541_v36  ;;  %v1545_v61 = vsel %vm3881_vm1, 0, %v1543_v8  ;;  %vm2112_vm7 = vcmp.lt.s32.totalorder %v3892_v37, 1 }
 0x209   :  { %v1871_v32 = vsel %vm1860_vm3, nan, %v1870_v22  ;;  %2745 = vcosq.f32 %v1544_v48  ;;  %v2569_v28 = vmin.u32 %v2458_v29, %v2456_v55  ;;  %vm2114_vm8 = vcmp.lt.s32.totalorder %v3892_v37, 3 }
 0x20a   :  { %2501 = vst [vmem:[#allocation2 + $0x28] sm:$0xff] %v1871_v32  ;;  %2747 = vsinq.f32 %v1544_v48  ;;  %v2128_v27 = vshll.u32 %v2088_v4, 8  ;;  %vm2115_vm9 = vcmp.lt.s32.totalorder %v3892_v37, 4  ;;  %v2120_v9 = vsel %vm2112_vm7, %v2099_v43, %v2102_v60 }
 0x20b   :  { %v2460_v44 = vclz %v2569_v28  ;;  %v2124_v6 = vsel %vm2112_vm7, %v2102_v60, %v2105_v35  ;;  %v2096_v52 = vshrl.u32 %v2781_v31, %v2095_v38  ;;  %v2117_v46 = vsel %vm2115_vm9, %v2105_v35, 2102212464 }
 0x20c   :  { %v2121_v42 = vsel %vm2115_vm9, %v2108_v40, 920167782  ;;  %v2125_v15 = vsel %vm2115_vm9, %v2111_v24, 1326507024  ;;  %vm2113_vm10 = vcmp.lt.s32.totalorder %v3892_v37, 2  ;;  %v1549_v5 = vadd.s32 3, %v1545_v61 }
 0x20d   :  { %v2570_v2 = vadd.s32 4294967294, %v2460_v44  ;;  %v2122_v18 = vsel %vm2114_vm8, %v2105_v35, %v2121_v42  ;;  %v2126_v33 = vsel %vm2114_vm8, %v2108_v40, %v2125_v15  ;;  %v2116_v7 = vsel %vm2112_vm7, %v2096_v52, %v2099_v43 }
 0x20e   :  { %v2123_v1 = vsel %vm2113_vm10, %v2120_v9, %v2122_v18  ;;  %v2127_v31 = vsel %vm2113_vm10, %v2124_v6, %v2126_v33  ;;  %v2118_v23 = vsel %vm2114_vm8, %v2102_v60, %v2117_v46  ;;  %v2448_v8 = vadd.s32 %v3859_v47, %v3865_v13 }
 0x20f   :  { %vm2571_vm11 = vcmp.lt.s32.totalorder %v2570_v2, 0  ;;  %v3938_v19 = vmul.u32.u64.low %v2128_v27, %v2127_v31  ;;  %v3939_v53 = vmul.u32.u64.high %v2128_v27, %v2127_v31, %v3938_v19  ;;  %v1550_v25 = vand.u32 3, %v1549_v5 }
 0x210   :  { %v2463_v38 = vsel %vm2571_vm11, 0, %v2570_v2  ;;  %v3941_v12 = vmul.u32.u64.low %v2128_v27, %v2123_v1  ;;  %v3942_v26 = vmul.u32.u64.high %v2128_v27, %v2123_v1, %v3941_v12  ;;  %v2119_v30 = vsel %vm2113_vm10, %v2116_v7, %v2118_v23 }
 0x211   :  { %v2464_v4 = vsub.s32 32, %v2463_v38  ;;  %v2468_v63 = vsub.s32 4294967266, %v2463_v38  ;;  %v2465_v17 = vshll.u32 %v2456_v55, %v2463_v38  ;;  %v2135_v57 = vmul.u32 %v2128_v27, %v2119_v30 }
 0x212   :  { %vm2137_vm12 = vc.u32 %v3939_v53, %v3941_v12  ;;  %v2138_v11 = vadd.s32 1, %v3942_v26  ;;  %vm1555_vm13 = vcmp.eq.s32.totalorder %v1550_v25, 2  ;;  %vm1551_vm14 = vcmp.lt.s32.totalorder %v1550_v25, 2 }
 0x213   :  { %v2466_v39 = vshrl.u32 %v2448_v8, %v2464_v4  ;;  %v2469_v62 = vadd.s32 127, %v2468_v63  ;;  %vm1552_vm15 = vcmp.eq.s32.totalorder %v1550_v25, 0  ;;  %vm1548_vm0 = vweird.f32 %v3631_v58 }
 0x214   :  { %v2139_v47 = vsel %vm2137_vm12, %v2138_v11, %v3942_v26  ;;  %vm2394_vm1 = vcmp.lt.s32.totalorder %v3764_v14, 0  ;;  %v2478_v29 = vsub.s32 4, %v3890_v3  ;;  %vm2393_vm2 = vcmp.le.f32.partialorder %v2392_v20, 0.7853982 }
 0x215   :  { %v2467_v10 = vor.u32 %v2466_v39, %v2465_v17  ;;  %v2470_v16 = vshll.u32 %v2469_v62, 23  ;;  %v2140_v37 = vadd.s32 %v2139_v47, %v2135_v57  ;;  %v2136_v52 = vadd.s32 %v3941_v12, %v3939_v53 }
 0x216   :  { %v2746_v51 = vpop.eup %2745  ;;  %v2479_v24 = vsel %vm2394_vm1, %v2478_v29, %v3890_v3  ;;  %vm2484_vm7 = vweird.f32 %v3764_v14  ;;  %vm2082_vm8 = vcmp.lt.s32.totalorder %v3803_v54, 0  ;;  %vm2081_vm9 = vcmp.le.f32.partialorder %v2080_v21, 0.7853982 }
 0x217   :  { %v2748_v49 = vpop.eup %2747  ;;  %v1556_v59 = vxor.u32 2147483648, %v2746_v51  ;;  %v2471_v0 = vor.u32 4788187, %v2470_v16  ;;  %v2474_v34 = vcvt.s32.f32 %v2467_v10  ;;  %v2141_v45 = vadd.s32 536870912, %v2140_v37 }
 0x218   :  { %v1553_v13 = vxor.u32 2147483648, %v2748_v49  ;;  %v2481_v61 = vsel %vm2393_vm2, 0, %v2479_v24 }
 0x219   :  { %v1557_v56 = vsel %vm1555_vm13, %v1556_v59, %v2748_v49  ;;  %v2472_v55 = vand.u32 2147483647, %v2471_v0  ;;  %v2142_v60 = vshrl.u32 %v2141_v45, 30  ;;  %v2485_v9 = vadd.s32 3, %v2481_v61 }
 0x21a   :  { %v1554_v41 = vsel %vm1552_vm15, %v2746_v51, %v1553_v13  ;;  %vm2172_vm13 = vweird.f32 %v3803_v54 }
 0x21b   :  { %v1558_v50 = vsel %vm1551_vm14, %v1554_v41, %v1557_v56  ;;  %v2475_v43 = vmul.f32 %v2474_v34, %v2472_v55  ;;  %v2143_v48 = vshll.u32 %v2142_v60, 30  ;;  %v2486_v42 = vand.u32 3, %v2485_v9 }
 0x21c   :  { %v1559_v36 = vsel %vm1548_vm0, nan, %v1558_v50  ;;  %v2166_v25 = vsub.s32 4, %v2142_v60 }
 0x21d   :  { %2498 = vst [vmem:[#allocation2 + $0x10] sm:$0xff] %v1559_v36  ;;  %v2476_v22 = vxor.u32 2147483648, %v2475_v43  ;;  %v2144_v32 = vsub.s32 %v2140_v37, %v2143_v48  ;;  %vm2491_vm4 = vcmp.eq.s32.totalorder %v2486_v42, 2  ;;  %vm2488_vm5 = vcmp.eq.s32.totalorder %v2486_v42, 0 }
 0x21e   :  { %vm2487_vm6 = vcmp.lt.s32.totalorder %v2486_v42, 2  ;;  %v2167_v39 = vsel %vm2082_vm8, %v2166_v25, %v2142_v60 }
 0x21f   :  { %v2477_v35 = vsel %vm2394_vm1, %v2476_v22, %v2475_v43  ;;  %v2146_v58 = vsub.s32 0, %v2144_v32 }
 0x220   :  { %v2480_v40 = vsel %vm2393_vm2, %v3764_v14, %v2477_v35  ;;  %v2169_v14 = vsel %vm2081_vm9, 0, %v2167_v39 }
 0x221   :  { %2749 = vcosq.f32 %v2480_v40  ;;  %v2557_v28 = vmin.u32 %v2146_v58, %v2144_v32  ;;  %v2173_v62 = vadd.s32 3, %v2169_v14 }
 0x222   :  { %2751 = vsinq.f32 %v2480_v40 }
 0x223   :  { %v2148_v27 = vclz %v2557_v28  ;;  %v2174_v11 = vand.u32 3, %v2173_v62 }
 0x225   :  { %v2558_v44 = vadd.s32 4294967294, %v2148_v27  ;;  %vm2179_vm10 = vcmp.eq.s32.totalorder %v2174_v11, 2  ;;  %vm2176_vm11 = vcmp.eq.s32.totalorder %v2174_v11, 0  ;;  %vm2175_vm12 = vcmp.lt.s32.totalorder %v2174_v11, 2 }
 0x227   :  { %vm2559_vm3 = vcmp.lt.s32.totalorder %v2558_v44, 0 }
 0x228   :  { %v2151_v6 = vsel %vm2559_vm3, 0, %v2558_v44 }
 0x229   :  { %v2152_v46 = vsub.s32 32, %v2151_v6  ;;  %v2156_v20 = vsub.s32 4294967266, %v2151_v6  ;;  %v2153_v15 = vshll.u32 %v2144_v32, %v2151_v6 }
 0x22b   :  { %v2154_v2 = vshrl.u32 %v2136_v52, %v2152_v46  ;;  %v2157_v18 = vadd.s32 127, %v2156_v20 }
 0x22d   :  { %v2155_v3 = vor.u32 %v2154_v2, %v2153_v15  ;;  %v2158_v1 = vshll.u32 %v2157_v18, 23 }
 0x22e   :  { %v2750_v33 = vpop.eup %2749 }
 0x22f   :  { %v2752_v5 = vpop.eup %2751  ;;  %v2492_v7 = vxor.u32 2147483648, %v2750_v33  ;;  %v2159_v19 = vor.u32 4788187, %v2158_v1  ;;  %v2162_v26 = vcvt.s32.f32 %v2155_v3 }
 0x230   :  { %v2489_v31 = vxor.u32 2147483648, %v2752_v5 }
 0x231   :  { %v2493_v23 = vsel %vm2491_vm4, %v2492_v7, %v2752_v5  ;;  %v2160_v12 = vand.u32 2147483647, %v2159_v19 }
 0x232   :  { %v2490_v38 = vsel %vm2488_vm5, %v2750_v33, %v2489_v31 }
 0x233   :  { %v2494_v53 = vsel %vm2487_vm6, %v2490_v38, %v2493_v23  ;;  %v2163_v4 = vmul.f32 %v2162_v26, %v2160_v12 }
 0x234   :  { %v2495_v8 = vsel %vm2484_vm7, nan, %v2494_v53 }
 0x235   :  { %2507 = vst [vmem:[#allocation2 + $0x58] sm:$0xff] %v2495_v8  ;;  %v2164_v63 = vxor.u32 2147483648, %v2163_v4 }
 0x237   :  { %v2165_v30 = vsel %vm2082_vm8, %v2164_v63, %v2163_v4 }
 0x238   :  { %v2168_v17 = vsel %vm2081_vm9, %v3803_v54, %v2165_v30 }
 0x239   :  { %2753 = vcosq.f32 %v2168_v17 }
 0x23a   :  { %2755 = vsinq.f32 %v2168_v17 }
 0x246   :  { %v2754_v51 = vpop.eup %2753 }
 0x247   :  { %v2756_v10 = vpop.eup %2755  ;;  %v2180_v16 = vxor.u32 2147483648, %v2754_v51 }
 0x248   :  { %v2177_v57 = vxor.u32 2147483648, %v2756_v10 }
 0x249   :  { %v2181_v49 = vsel %vm2179_vm10, %v2180_v16, %v2756_v10 }
 0x24a   :  { %v2178_v21 = vsel %vm2176_vm11, %v2754_v51, %v2177_v57 }
 0x24b   :  { %v2182_v59 = vsel %vm2175_vm12, %v2178_v21, %v2181_v49 }
 0x24c   :  { %v2183_v47 = vsel %vm2172_vm13, nan, %v2182_v59 }
 0x24d   :  { %2504 = vst [vmem:[#allocation2 + $0x40] sm:$0xff] %v2183_v47 }
 0x24e   :  { %2769 = shalt.err (!%p2766_p4)
}
 0x24f   :  { %s2788_s28 = smov 384   ;;  %s2789_s29 = smov 24  }
 0x250   :  { %2519 = dma.vmem_to_hbm [thread:$0]  %s2514_s26, 1536, %s3971_s3, [#allocation3], %s2788_s28, %s2788_s28, %s2789_s29  }
 0x251   :  { %2778 = dma.done.wait [#allocation3], 1536  }
 0x252   :  { %2779 = vsyncadd [#allocation3], 4294965760 }
 0x253   :  { %2523 = vsyncpa [#allocation3], 1 }

</bundles_post_ra>
